<compile_context>
chip_gen: v7x
topology: tpu7x:2x2x1
jax: 0.10.0
libtpu: 0.0.40
codegen_flags: <defaults>
</compile_context>

<pallas_src>
import jax
import jax.numpy as jnp
import numpy as np
from jax import lax
from jax.experimental import pallas as pl
from jax.experimental.pallas import tpu as pltpu

_EPS = 1e-5


def _round_up(x, m):
    return ((x + m - 1) // m) * m


# ---------------------------------------------------------------------------
# Fused encoder forward builder
# ---------------------------------------------------------------------------
def make_encoder_forward(n_img, in_ch, height, width, filters, kernel, expansion):
    stride, pad = 2, 1
    c1 = filters
    c2 = filters * expansion

    oh1 = (height + 2 * pad - kernel) // stride + 1      # 7
    ow1 = (width + 2 * pad - kernel) // stride + 1       # 7
    h1p, w1p = oh1 + 2 * pad, ow1 + 2 * pad              # 9, 9 (zero-padded h1 grid)
    oh2 = (h1p - kernel) // stride + 1                   # 3
    ow2 = (w1p - kernel) // stride + 1                   # 3

    # structural assumptions of this fused kernel (hold for the 16x16 config)
    assert stride == 2 and pad == 1 and kernel == 5
    assert ow1 + 1 == 8, "one 8-row group per conv1 output row is assumed"

    n_even = (w1p + 1) // 2                  # even-x columns in the parity layout (5)
    pad_j = ow1 // 2                         # zero slot inside each 8-row group (3)
    m1_true = n_img * oh1 * ow1              # 98 real conv1 outputs
    m1_rows = n_img * oh1 * 8                # 112 (8-aligned row groups)
    m2_true = n_img * oh2 * ow2              # 18 conv2 outputs
    k1 = kernel * kernel * in_ch             # 100
    k1_pad = _round_up(k1, 128)              # 128

    # conv2 tap (ki,kj): start row of its contiguous ow2-row slice of an h1 row
    # (parity-ordered x axis: even x stored at [0, n_even), odd x at [n_even, w1p))
    xs_for_kj = [kj // 2 if kj % 2 == 0 else n_even + kj // 2 for kj in range(kernel)]

    def encoder_kernel(p1_ref, w1_ref, g1_ref, b1_ref,
                       w2_ref, g2_ref, b2_ref,
                       o_ref, h1_ref, acc_ref):
        ki = pl.program_id(0)

        # ---- grid step 0: conv1 + BN1(train) + ReLU -> padded h1 in VMEM ----
        @pl.when(ki == 0)
        def _():
            h1_ref[...] = jnp.zeros_like(h1_ref)
            acc_ref[...] = jnp.zeros_like(acc_ref)

            a1 = jnp.dot(p1_ref[...], w1_ref[...],
                         preferred_element_type=jnp.float32)          # (112, 64)
            inv_m = 1.0 / float(m1_true)
            # group-pad rows of p1 are exact zeros -> contribute 0 to the sum
            mean = jnp.sum(a1, axis=0, keepdims=True) * inv_m
            j = lax.broadcasted_iota(jnp.int32, (m1_rows, 1), 0) % 8
            valid = j != pad_j
            cent = jnp.where(valid, a1 - mean, 0.0)                   # two-pass var
            var = jnp.sum(cent * cent, axis=0, keepdims=True) * inv_m
            scale = lax.rsqrt(var + _EPS) * g1_ref[...]               # EUP rsqrt
            shift = b1_ref[...] - mean * scale
            y1 = jnp.where(valid, jnp.maximum(a1 * scale + shift, 0.0), 0.0)
            # scatter the 8-row groups into the parity-ordered, zero-padded h1
            for g in range(n_img * oh1):                              # 14 groups
                n, oh = divmod(g, oh1)
                h1_ref[n * h1p + oh + 1, 1:1 + ow1 + 1, :] = y1[8 * g:8 * g + 8, :]

        # ---- every step: conv2 partial sums for kernel row `ki` (5 taps) ----
        for g2 in range(n_img * oh2):                                 # 6 (n, oh2) groups
            n, oh = divmod(g2, oh2)
            row = h1_ref[n * h1p + 2 * oh + ki]                       # (w1p, 64)
            part = jnp.zeros((ow2, c2), jnp.float32)
            for kj in range(kernel):
                xs = xs_for_kj[kj]
                part = part + jnp.dot(row[xs:xs + ow2, :], w2_ref[kj],
                                      preferred_element_type=jnp.float32)
            acc_ref[ow2 * g2:ow2 * g2 + ow2, :] += part

        # ---- last step: BN2(train) + ReLU epilogue, lane-dense output -------
        @pl.when(ki == pl.num_programs(0) - 1)
        def _():
            acc = acc_ref[...]                                        # (18, 128)
            inv_m = 1.0 / float(m2_true)
            mean = jnp.sum(acc, axis=0, keepdims=True) * inv_m
            cent = acc - mean
            var = jnp.sum(cent * cent, axis=0, keepdims=True) * inv_m
            scale = lax.rsqrt(var + _EPS) * g2_ref[...]
            shift = b2_ref[...] - mean * scale
            o_ref[...] = jnp.maximum(acc * scale + shift, 0.0)

    flops = 2 * m1_rows * k1_pad * c1 + 2 * m2_true * kernel * kernel * c1 * c2
    bytes_accessed = 4 * (m1_rows * k1_pad + k1_pad * c1
                          + kernel * kernel * c1 * c2 + 2 * (c1 + c2)
                          + m2_true * c2)

    fused = pl.pallas_call(
        encoder_kernel,
        out_shape=jax.ShapeDtypeStruct((m2_true, c2), jnp.float32),
        grid=(kernel,),
        in_specs=[
            pl.BlockSpec((m1_rows, k1_pad), lambda k: (0, 0)),      # conv1 patches
            pl.BlockSpec((k1_pad, c1), lambda k: (0, 0)),           # conv1 weights
            pl.BlockSpec((1, c1), lambda k: (0, 0)),                # gamma1
            pl.BlockSpec((1, c1), lambda k: (0, 0)),                # beta1
            pl.BlockSpec((kernel, c1, c2), lambda k: (k, 0, 0)),    # conv2 weights (row ki)
            pl.BlockSpec((1, c2), lambda k: (0, 0)),                # gamma2
            pl.BlockSpec((1, c2), lambda k: (0, 0)),                # beta2
        ],
        out_specs=pl.BlockSpec((m2_true, c2), lambda k: (0, 0)),
        scratch_shapes=[
            pltpu.VMEM((n_img * h1p, w1p, c1), jnp.float32),        # padded h1
            pltpu.VMEM((m2_true, c2), jnp.float32),                 # conv2 accumulator
        ],
        compiler_params=pltpu.CompilerParams(
            dimension_semantics=("arbitrary",),
            vmem_limit_bytes=32 * 1024 * 1024),
        cost_estimate=pl.CostEstimate(flops=flops, transcendentals=c1 + c2,
                                      bytes_accessed=bytes_accessed),
    )

    # within-group row order so each conv1 output row is ONE contiguous slab of
    # the parity-ordered h1 grid: [ow=1,3,5 (even x), zero slot, ow=0,2,4,6 (odd x)]
    take_idx = jnp.array(list(range(1, ow1, 2)) + [ow1] + list(range(0, ow1, 2)),
                         dtype=jnp.int32)

    def forward(x_nchw, params):
        # conv1 im2col (feature order (c, ki, kj)) -- a single XLA patches op
        p = lax.conv_general_dilated_patches(
            x_nchw, (kernel, kernel), (stride, stride), ((pad, pad), (pad, pad)))
        p = jnp.transpose(p, (0, 2, 3, 1))                          # (N, OH1, OW1, k1)
        p = jnp.pad(p, ((0, 0), (0, 0), (0, 8 - ow1), (0, k1_pad - k1)))
        p = jnp.take(p, take_idx, axis=2)                           # 8-row aligned groups
        p1 = p.reshape(m1_rows, k1_pad)

        out = fused(p1, params["w1m"], params["g1"], params["be1"],
                    params["w2m"], params["g2"], params["be2"])     # (18, 128)
        out = out.reshape(n_img, oh2, ow2, c2)
        return jnp.transpose(out, (0, 3, 1, 2))                     # NHWC -> NCHW

    return forward


# ---------------------------------------------------------------------------
# Parameters (init + one-time prep) and pure-XLA reference
# ---------------------------------------------------------------------------
def init_raw_params(key, in_ch, filters, kernel, expansion):
    """Matches Encoder._initialize_weights: conv kaiming_normal_(fan_out, relu),
    conv bias = 0, BN weight = 1, BN bias = 0."""
    c2 = filters * expansion
    k1, k2 = jax.random.split(key)
    w1 = jax.random.normal(k1, (filters, in_ch, kernel, kernel), jnp.float32) \
        * jnp.sqrt(2.0 / (filters * kernel * kernel))
    w2 = jax.random.normal(k2, (c2, filters, kernel, kernel), jnp.float32) \
        * jnp.sqrt(2.0 / (c2 * kernel * kernel))
    return dict(w1=w1, g1=jnp.ones((filters,), jnp.float32),
                be1=jnp.zeros((filters,), jnp.float32),
                w2=w2, g2=jnp.ones((c2,), jnp.float32),
                be2=jnp.zeros((c2,), jnp.float32))


def prepare_params(raw, in_ch, filters, kernel, expansion):
    """One-time (hoisted) weight prep:
       conv1 -> im2col matmul layout, features ordered (c, ki, kj), K padded to 128;
       conv2 -> 25 per-tap (Cin, Cout) matrices, NO channel padding (Cin = filters)."""
    c1, c2 = filters, filters * expansion
    k1 = kernel * kernel * in_ch
    k1_pad = _round_up(k1, 128)
    w1m = jnp.transpose(raw["w1"], (1, 2, 3, 0)).reshape(k1, c1)
    w1m = jnp.pad(w1m, ((0, k1_pad - k1), (0, 0)))
    w2m = jnp.transpose(raw["w2"], (2, 3, 1, 0)).reshape(kernel * kernel, c1, c2)
    return dict(w1m=w1m, g1=raw["g1"].reshape(1, c1), be1=raw["be1"].reshape(1, c1),
                w2m=w2m, g2=raw["g2"].reshape(1, c2), be2=raw["be2"].reshape(1, c2))


def reference_forward(x, raw):
    """Pure-XLA f32 reference = PyTorch Encoder.forward in training mode."""
    dn = ("NCHW", "OIHW", "NCHW")

    def block(h, w, g, b):
        y = lax.conv_general_dilated(h, w, (2, 2), ((1, 1), (1, 1)),
                                     dimension_numbers=dn)
        mean = jnp.mean(y, axis=(0, 2, 3), keepdims=True)
        var = jnp.mean(jnp.square(y - mean), axis=(0, 2, 3), keepdims=True)
        y = (y - mean) * lax.rsqrt(var + _EPS)
        y = y * g.reshape(1, -1, 1, 1) + b.reshape(1, -1, 1, 1)
        return jnp.maximum(y, 0.0)

    h = block(x, raw["w1"], raw["g1"], raw["be1"])
    return block(h, raw["w2"], raw["g2"], raw["be2"])


# ---------------------------------------------------------------------------
if __name__ == "__main__":
    # Encoder(in_shape=(4, 16, 16), filters=64, kernel_size=5, expansions=[2])
    n_img, in_ch, height, width = 2, 4, 16, 16
    filters, kernel, expansions = 64, 5, [2]

    key = jax.random.PRNGKey(0)
    kx, kp = jax.random.split(key)
    x = jax.random.normal(kx, (n_img, in_ch, height, width), jnp.float32)   # NCHW

    raw = init_raw_params(kp, in_ch, filters, kernel, expansions[0])
    params = prepare_params(raw, in_ch, filters, kernel, expansions[0])

    fwd = jax.jit(make_encoder_forward(n_img, in_ch, height, width,
                                       filters, kernel, expansions[0]))
    out = jax.block_until_ready(fwd(x, params))

    # 16 -> 7 -> 3 spatially (k=5, s=2, p=1); channels 4 -> 64 -> 128.
    assert out.shape == (n_img, filters * expansions[0], 3, 3), out.shape
    assert out.dtype == jnp.float32
    assert bool(jnp.all(out >= 0.0))                      # ReLU output

    # numerical check against the pure-XLA reference (tolerance covers the
    # MXU's default bf16-pass matmul precision on both paths)
    ref = jax.jit(reference_forward)(x, raw)
    np.testing.assert_allclose(np.asarray(out), np.asarray(ref),
                               rtol=5e-2, atol=5e-2)
    print("KERNEL_OK")
</pallas_src>

<mosaic_0001>
module attributes {stable_mosaic.version = 11 : i64} {
  func.func @encoder_kernel(%arg0: i32, %arg1: memref<112x128xf32, #tpu.memory_space<vmem>>, %arg2: memref<128x64xf32, #tpu.memory_space<vmem>>, %arg3: memref<1x64xf32, #tpu.memory_space<vmem>>, %arg4: memref<1x64xf32, #tpu.memory_space<vmem>>, %arg5: memref<5x64x128xf32, #tpu.memory_space<vmem>>, %arg6: memref<1x128xf32, #tpu.memory_space<vmem>>, %arg7: memref<1x128xf32, #tpu.memory_space<vmem>>, %arg8: memref<18x128xf32, #tpu.memory_space<vmem>>, %arg9: memref<18x9x64xf32, #tpu.memory_space<vmem>>, %arg10: memref<18x128xf32, #tpu.memory_space<vmem>>) attributes {dimension_semantics = [#tpu.dimension_semantics<arbitrary>], iteration_bounds = array<i64: 5>, scalar_prefetch = 0 : i64, scratch_operands = 2 : i64, tpu.core_type = #tpu.core_type<tc>, window_params = [{pipeline_mode = #tpu.pipeline_mode<synchronous>, transform_indices = @transform_0, window_bounds = array<i64: 112, 128>}, {pipeline_mode = #tpu.pipeline_mode<synchronous>, transform_indices = @transform_1, window_bounds = array<i64: 128, 64>}, {pipeline_mode = #tpu.pipeline_mode<synchronous>, transform_indices = @transform_2, window_bounds = array<i64: 1, 64>}, {pipeline_mode = #tpu.pipeline_mode<synchronous>, transform_indices = @transform_3, window_bounds = array<i64: 1, 64>}, {transform_indices = @transform_4, window_bounds = array<i64: 5, 64, 128>}, {pipeline_mode = #tpu.pipeline_mode<synchronous>, transform_indices = @transform_5, window_bounds = array<i64: 1, 128>}, {pipeline_mode = #tpu.pipeline_mode<synchronous>, transform_indices = @transform_6, window_bounds = array<i64: 1, 128>}, {pipeline_mode = #tpu.pipeline_mode<synchronous>, transform_indices = @transform_7, window_bounds = array<i64: 18, 128>}]} {
    %c0_i32 = arith.constant 0 : i32
    %0 = arith.cmpi eq, %arg0, %c0_i32 : i32
    %1 = arith.extui %0 : i1 to i32
    %c0_i32_0 = arith.constant 0 : i32
    %2 = arith.cmpi ne, %1, %c0_i32_0 : i32
    scf.if %2 {
      %cst_156 = arith.constant 0.000000e+00 : f32
      %204 = vector.broadcast %cst_156 : f32 to vector<18x9x64xf32>
      %c0_157 = arith.constant 0 : index
      %c0_158 = arith.constant 0 : index
      %c0_159 = arith.constant 0 : index
      %205 = vector.load %arg9[%c0_157, %c0_158, %c0_159] : memref<18x9x64xf32, #tpu.memory_space<vmem>>, vector<18x9x64xf32>
      tpu.vector_store %arg9[%c0_157, %c0_158, %c0_159], %204 {strides = array<i32>} : memref<18x9x64xf32, #tpu.memory_space<vmem>>, vector<18x9x64xf32>,
      %cst_160 = arith.constant 0.000000e+00 : f32
      %206 = vector.broadcast %cst_160 : f32 to vector<18x128xf32>
      %c0_161 = arith.constant 0 : index
      %c0_162 = arith.constant 0 : index
      %207 = vector.load %arg10[%c0_161, %c0_162] : memref<18x128xf32, #tpu.memory_space<vmem>>, vector<18x128xf32>
      tpu.vector_store %arg10[%c0_161, %c0_162], %206 {strides = array<i32>} : memref<18x128xf32, #tpu.memory_space<vmem>>, vector<18x128xf32>,
      %c0_163 = arith.constant 0 : index
      %c0_164 = arith.constant 0 : index
      %208 = vector.load %arg1[%c0_163, %c0_164] : memref<112x128xf32, #tpu.memory_space<vmem>>, vector<112x128xf32>
      %c0_165 = arith.constant 0 : index
      %c0_166 = arith.constant 0 : index
      %209 = vector.load %arg2[%c0_165, %c0_166] : memref<128x64xf32, #tpu.memory_space<vmem>>, vector<128x64xf32>
      %cst_167 = arith.constant dense<0.000000e+00> : vector<112x64xf32>
      %210 = tpu.matmul %208, %209, %cst_167 {dimension_numbers = #tpu.dot_dimension_numbers<[1], [0], [0], [1], [0, 0, 1, 1], [], []>} : vector<112x128xf32>, vector<128x64xf32>, vector<112x64xf32> -> vector<112x64xf32>
      %cst_168 = arith.constant dense<0.000000e+00> : vector<64xf32>
      %211 = vector.multi_reduction <add>, %210, %cst_168 [0] : vector<112x64xf32> to vector<64xf32>
      %212 = vector.shape_cast %211 : vector<64xf32> to vector<1x64xf32>
      %cst_169 = arith.constant 0.0102040814 : f32
      %213 = vector.broadcast %cst_169 : f32 to vector<1x64xf32>
      %214 = arith.mulf %212, %213 : vector<1x64xf32>
      %215 = tpu.iota {dimensions = array<i32: 0>} : vector<112x1xi32>
      %c8_i32 = arith.constant 8 : i32
      %c0_i32_170 = arith.constant 0 : i32
      %216 = arith.cmpi eq, %c8_i32, %c0_i32_170 : i32
      %c1_i32 = arith.constant 1 : i32
      %217 = arith.select %216, %c1_i32, %c8_i32 : i32
      %218 = vector.broadcast %217 : i32 to vector<112x1xi32>
      %219 = arith.remsi %215, %218 : vector<112x1xi32>
      %c0_i32_171 = arith.constant 0 : i32
      %220 = vector.broadcast %c0_i32_171 : i32 to vector<112x1xi32>
      %221 = arith.cmpi ne, %219, %220 : vector<112x1xi32>
      %c0_i32_172 = arith.constant 0 : i32
      %222 = vector.broadcast %c0_i32_172 : i32 to vector<112x1xi32>
      %223 = arith.cmpi slt, %219, %222 : vector<112x1xi32>
      %c0_i32_173 = arith.constant 0 : i32
      %224 = arith.cmpi slt, %217, %c0_i32_173 : i32
      %225 = vector.broadcast %224 : i1 to vector<112x1xi1>
      %226 = vector.broadcast %225 : vector<112x1xi1> to vector<112x1xi1>
      %227 = arith.xori %223, %226 : vector<112x1xi1>
      %228 = arith.andi %227, %221 : vector<112x1xi1>
      %229 = vector.broadcast %217 : i32 to vector<112x1xi32>
      %230 = arith.addi %219, %229 : vector<112x1xi32>
      %231 = arith.select %228, %230, %219 : vector<112x1xi1>, vector<112x1xi32>
      %c3_i32 = arith.constant 3 : i32
      %232 = vector.broadcast %c3_i32 : i32 to vector<112x1xi32>
      %233 = arith.cmpi ne, %231, %232 : vector<112x1xi32>
      %234 = vector.broadcast %214 : vector<1x64xf32> to vector<112x64xf32>
      %235 = arith.subf %210, %234 : vector<112x64xf32>
      %cst_174 = arith.constant 0.000000e+00 : f32
      %236 = vector.shape_cast %233 : vector<112x1xi1> to vector<112x1xi1>
      %237 = vector.broadcast %236 : vector<112x1xi1> to vector<112x64xi1>
      %238 = vector.broadcast %cst_174 : f32 to vector<112x64xf32>
      %239 = arith.select %237, %235, %238 : vector<112x64xi1>, vector<112x64xf32>
      %240 = arith.mulf %239, %239 : vector<112x64xf32>
      %cst_175 = arith.constant dense<0.000000e+00> : vector<64xf32>
      %241 = vector.multi_reduction <add>, %240, %cst_175 [0] : vector<112x64xf32> to vector<64xf32>
      %242 = vector.shape_cast %241 : vector<64xf32> to vector<1x64xf32>
      %cst_176 = arith.constant 0.0102040814 : f32
      %243 = vector.broadcast %cst_176 : f32 to vector<1x64xf32>
      %244 = arith.mulf %242, %243 : vector<1x64xf32>
      %cst_177 = arith.constant 9.99999974E-6 : f32
      %245 = vector.broadcast %cst_177 : f32 to vector<1x64xf32>
      %246 = arith.addf %244, %245 : vector<1x64xf32>
      %247 = math.rsqrt %246 : vector<1x64xf32>
      %c0_178 = arith.constant 0 : index
      %c0_179 = arith.constant 0 : index
      %248 = vector.load %arg3[%c0_178, %c0_179] : memref<1x64xf32, #tpu.memory_space<vmem>>, vector<1x64xf32>
      %249 = arith.mulf %247, %248 : vector<1x64xf32>
      %c0_180 = arith.constant 0 : index
      %c0_181 = arith.constant 0 : index
      %250 = vector.load %arg4[%c0_180, %c0_181] : memref<1x64xf32, #tpu.memory_space<vmem>>, vector<1x64xf32>
      %251 = arith.mulf %214, %249 : vector<1x64xf32>
      %252 = arith.subf %250, %251 : vector<1x64xf32>
      %253 = vector.broadcast %249 : vector<1x64xf32> to vector<112x64xf32>
      %254 = arith.mulf %210, %253 : vector<112x64xf32>
      %255 = vector.broadcast %252 : vector<1x64xf32> to vector<112x64xf32>
      %256 = arith.addf %254, %255 : vector<112x64xf32>
      %cst_182 = arith.constant 0.000000e+00 : f32
      %257 = vector.broadcast %cst_182 : f32 to vector<112x64xf32>
      %258 = arith.maximumf %256, %257 : vector<112x64xf32>
      %cst_183 = arith.constant 0.000000e+00 : f32
      %259 = vector.shape_cast %233 : vector<112x1xi1> to vector<112x1xi1>
      %260 = vector.broadcast %259 : vector<112x1xi1> to vector<112x64xi1>
      %261 = vector.broadcast %cst_183 : f32 to vector<112x64xf32>
      %262 = arith.select %260, %258, %261 : vector<112x64xi1>, vector<112x64xf32>
      %263 = vector.extract_strided_slice %262 {offsets = [0, 0], sizes = [8, 64], strides = [1, 1]} : vector<112x64xf32> to vector<8x64xf32>
      %c1_184 = arith.constant 1 : index
      %c1_185 = arith.constant 1 : index
      %c0_186 = arith.constant 0 : index
      %264 = vector.load %arg9[%c1_184, %c1_185, %c0_186] : memref<18x9x64xf32, #tpu.memory_space<vmem>>, vector<1x8x64xf32>
      %265 = vector.shape_cast %264 : vector<1x8x64xf32> to vector<8x64xf32>
      %266 = vector.shape_cast %263 : vector<8x64xf32> to vector<1x8x64xf32>
      tpu.vector_store %arg9[%c1_184, %c1_185, %c0_186], %266 {strides = array<i32>} : memref<18x9x64xf32, #tpu.memory_space<vmem>>, vector<1x8x64xf32>,
      %267 = vector.extract_strided_slice %262 {offsets = [8, 0], sizes = [8, 64], strides = [1, 1]} : vector<112x64xf32> to vector<8x64xf32>
      %c2_187 = arith.constant 2 : index
      %c1_188 = arith.constant 1 : index
      %c0_189 = arith.constant 0 : index
      %268 = vector.load %arg9[%c2_187, %c1_188, %c0_189] : memref<18x9x64xf32, #tpu.memory_space<vmem>>, vector<1x8x64xf32>
      %269 = vector.shape_cast %268 : vector<1x8x64xf32> to vector<8x64xf32>
      %270 = vector.shape_cast %267 : vector<8x64xf32> to vector<1x8x64xf32>
      tpu.vector_store %arg9[%c2_187, %c1_188, %c0_189], %270 {strides = array<i32>} : memref<18x9x64xf32, #tpu.memory_space<vmem>>, vector<1x8x64xf32>,
      %271 = vector.extract_strided_slice %262 {offsets = [16, 0], sizes = [8, 64], strides = [1, 1]} : vector<112x64xf32> to vector<8x64xf32>
      %c3_190 = arith.constant 3 : index
      %c1_191 = arith.constant 1 : index
      %c0_192 = arith.constant 0 : index
      %272 = vector.load %arg9[%c3_190, %c1_191, %c0_192] : memref<18x9x64xf32, #tpu.memory_space<vmem>>, vector<1x8x64xf32>
      %273 = vector.shape_cast %272 : vector<1x8x64xf32> to vector<8x64xf32>
      %274 = vector.shape_cast %271 : vector<8x64xf32> to vector<1x8x64xf32>
      tpu.vector_store %arg9[%c3_190, %c1_191, %c0_192], %274 {strides = array<i32>} : memref<18x9x64xf32, #tpu.memory_space<vmem>>, vector<1x8x64xf32>,
      %275 = vector.extract_strided_slice %262 {offsets = [24, 0], sizes = [8, 64], strides = [1, 1]} : vector<112x64xf32> to vector<8x64xf32>
      %c4_193 = arith.constant 4 : index
      %c1_194 = arith.constant 1 : index
      %c0_195 = arith.constant 0 : index
      %276 = vector.load %arg9[%c4_193, %c1_194, %c0_195] : memref<18x9x64xf32, #tpu.memory_space<vmem>>, vector<1x8x64xf32>
      %277 = vector.shape_cast %276 : vector<1x8x64xf32> to vector<8x64xf32>
      %278 = vector.shape_cast %275 : vector<8x64xf32> to vector<1x8x64xf32>
      tpu.vector_store %arg9[%c4_193, %c1_194, %c0_195], %278 {strides = array<i32>} : memref<18x9x64xf32, #tpu.memory_space<vmem>>, vector<1x8x64xf32>,
      %279 = vector.extract_strided_slice %262 {offsets = [32, 0], sizes = [8, 64], strides = [1, 1]} : vector<112x64xf32> to vector<8x64xf32>
      %c5 = arith.constant 5 : index
      %c1_196 = arith.constant 1 : index
      %c0_197 = arith.constant 0 : index
      %280 = vector.load %arg9[%c5, %c1_196, %c0_197] : memref<18x9x64xf32, #tpu.memory_space<vmem>>, vector<1x8x64xf32>
      %281 = vector.shape_cast %280 : vector<1x8x64xf32> to vector<8x64xf32>
      %282 = vector.shape_cast %279 : vector<8x64xf32> to vector<1x8x64xf32>
      tpu.vector_store %arg9[%c5, %c1_196, %c0_197], %282 {strides = array<i32>} : memref<18x9x64xf32, #tpu.memory_space<vmem>>, vector<1x8x64xf32>,
      %283 = vector.extract_strided_slice %262 {offsets = [40, 0], sizes = [8, 64], strides = [1, 1]} : vector<112x64xf32> to vector<8x64xf32>
      %c6_198 = arith.constant 6 : index
      %c1_199 = arith.constant 1 : index
      %c0_200 = arith.constant 0 : index
      %284 = vector.load %arg9[%c6_198, %c1_199, %c0_200] : memref<18x9x64xf32, #tpu.memory_space<vmem>>, vector<1x8x64xf32>
      %285 = vector.shape_cast %284 : vector<1x8x64xf32> to vector<8x64xf32>
      %286 = vector.shape_cast %283 : vector<8x64xf32> to vector<1x8x64xf32>
      tpu.vector_store %arg9[%c6_198, %c1_199, %c0_200], %286 {strides = array<i32>} : memref<18x9x64xf32, #tpu.memory_space<vmem>>, vector<1x8x64xf32>,
      %287 = vector.extract_strided_slice %262 {offsets = [48, 0], sizes = [8, 64], strides = [1, 1]} : vector<112x64xf32> to vector<8x64xf32>
      %c7 = arith.constant 7 : index
      %c1_201 = arith.constant 1 : index
      %c0_202 = arith.constant 0 : index
      %288 = vector.load %arg9[%c7, %c1_201, %c0_202] : memref<18x9x64xf32, #tpu.memory_space<vmem>>, vector<1x8x64xf32>
      %289 = vector.shape_cast %288 : vector<1x8x64xf32> to vector<8x64xf32>
      %290 = vector.shape_cast %287 : vector<8x64xf32> to vector<1x8x64xf32>
      tpu.vector_store %arg9[%c7, %c1_201, %c0_202], %290 {strides = array<i32>} : memref<18x9x64xf32, #tpu.memory_space<vmem>>, vector<1x8x64xf32>,
      %291 = vector.extract_strided_slice %262 {offsets = [56, 0], sizes = [8, 64], strides = [1, 1]} : vector<112x64xf32> to vector<8x64xf32>
      %c10 = arith.constant 10 : index
      %c1_203 = arith.constant 1 : index
      %c0_204 = arith.constant 0 : index
      %292 = vector.load %arg9[%c10, %c1_203, %c0_204] : memref<18x9x64xf32, #tpu.memory_space<vmem>>, vector<1x8x64xf32>
      %293 = vector.shape_cast %292 : vector<1x8x64xf32> to vector<8x64xf32>
      %294 = vector.shape_cast %291 : vector<8x64xf32> to vector<1x8x64xf32>
      tpu.vector_store %arg9[%c10, %c1_203, %c0_204], %294 {strides = array<i32>} : memref<18x9x64xf32, #tpu.memory_space<vmem>>, vector<1x8x64xf32>,
      %295 = vector.extract_strided_slice %262 {offsets = [64, 0], sizes = [8, 64], strides = [1, 1]} : vector<112x64xf32> to vector<8x64xf32>
      %c11 = arith.constant 11 : index
      %c1_205 = arith.constant 1 : index
      %c0_206 = arith.constant 0 : index
      %296 = vector.load %arg9[%c11, %c1_205, %c0_206] : memref<18x9x64xf32, #tpu.memory_space<vmem>>, vector<1x8x64xf32>
      %297 = vector.shape_cast %296 : vector<1x8x64xf32> to vector<8x64xf32>
      %298 = vector.shape_cast %295 : vector<8x64xf32> to vector<1x8x64xf32>
      tpu.vector_store %arg9[%c11, %c1_205, %c0_206], %298 {strides = array<i32>} : memref<18x9x64xf32, #tpu.memory_space<vmem>>, vector<1x8x64xf32>,
      %299 = vector.extract_strided_slice %262 {offsets = [72, 0], sizes = [8, 64], strides = [1, 1]} : vector<112x64xf32> to vector<8x64xf32>
      %c12_207 = arith.constant 12 : index
      %c1_208 = arith.constant 1 : index
      %c0_209 = arith.constant 0 : index
      %300 = vector.load %arg9[%c12_207, %c1_208, %c0_209] : memref<18x9x64xf32, #tpu.memory_space<vmem>>, vector<1x8x64xf32>
      %301 = vector.shape_cast %300 : vector<1x8x64xf32> to vector<8x64xf32>
      %302 = vector.shape_cast %299 : vector<8x64xf32> to vector<1x8x64xf32>
      tpu.vector_store %arg9[%c12_207, %c1_208, %c0_209], %302 {strides = array<i32>} : memref<18x9x64xf32, #tpu.memory_space<vmem>>, vector<1x8x64xf32>,
      %303 = vector.extract_strided_slice %262 {offsets = [80, 0], sizes = [8, 64], strides = [1, 1]} : vector<112x64xf32> to vector<8x64xf32>
      %c13 = arith.constant 13 : index
      %c1_210 = arith.constant 1 : index
      %c0_211 = arith.constant 0 : index
      %304 = vector.load %arg9[%c13, %c1_210, %c0_211] : memref<18x9x64xf32, #tpu.memory_space<vmem>>, vector<1x8x64xf32>
      %305 = vector.shape_cast %304 : vector<1x8x64xf32> to vector<8x64xf32>
      %306 = vector.shape_cast %303 : vector<8x64xf32> to vector<1x8x64xf32>
      tpu.vector_store %arg9[%c13, %c1_210, %c0_211], %306 {strides = array<i32>} : memref<18x9x64xf32, #tpu.memory_space<vmem>>, vector<1x8x64xf32>,
      %307 = vector.extract_strided_slice %262 {offsets = [88, 0], sizes = [8, 64], strides = [1, 1]} : vector<112x64xf32> to vector<8x64xf32>
      %c14 = arith.constant 14 : index
      %c1_212 = arith.constant 1 : index
      %c0_213 = arith.constant 0 : index
      %308 = vector.load %arg9[%c14, %c1_212, %c0_213] : memref<18x9x64xf32, #tpu.memory_space<vmem>>, vector<1x8x64xf32>
      %309 = vector.shape_cast %308 : vector<1x8x64xf32> to vector<8x64xf32>
      %310 = vector.shape_cast %307 : vector<8x64xf32> to vector<1x8x64xf32>
      tpu.vector_store %arg9[%c14, %c1_212, %c0_213], %310 {strides = array<i32>} : memref<18x9x64xf32, #tpu.memory_space<vmem>>, vector<1x8x64xf32>,
      %311 = vector.extract_strided_slice %262 {offsets = [96, 0], sizes = [8, 64], strides = [1, 1]} : vector<112x64xf32> to vector<8x64xf32>
      %c15_214 = arith.constant 15 : index
      %c1_215 = arith.constant 1 : index
      %c0_216 = arith.constant 0 : index
      %312 = vector.load %arg9[%c15_214, %c1_215, %c0_216] : memref<18x9x64xf32, #tpu.memory_space<vmem>>, vector<1x8x64xf32>
      %313 = vector.shape_cast %312 : vector<1x8x64xf32> to vector<8x64xf32>
      %314 = vector.shape_cast %311 : vector<8x64xf32> to vector<1x8x64xf32>
      tpu.vector_store %arg9[%c15_214, %c1_215, %c0_216], %314 {strides = array<i32>} : memref<18x9x64xf32, #tpu.memory_space<vmem>>, vector<1x8x64xf32>,
      %315 = vector.extract_strided_slice %262 {offsets = [104, 0], sizes = [8, 64], strides = [1, 1]} : vector<112x64xf32> to vector<8x64xf32>
      %c16 = arith.constant 16 : index
      %c1_217 = arith.constant 1 : index
      %c0_218 = arith.constant 0 : index
      %316 = vector.load %arg9[%c16, %c1_217, %c0_218] : memref<18x9x64xf32, #tpu.memory_space<vmem>>, vector<1x8x64xf32>
      %317 = vector.shape_cast %316 : vector<1x8x64xf32> to vector<8x64xf32>
      %318 = vector.shape_cast %315 : vector<8x64xf32> to vector<1x8x64xf32>
      tpu.vector_store %arg9[%c16, %c1_217, %c0_218], %318 {strides = array<i32>} : memref<18x9x64xf32, #tpu.memory_space<vmem>>, vector<1x8x64xf32>,
    } else {
    }
    %c0_i32_1 = arith.constant 0 : i32
    %3 = arith.addi %c0_i32_1, %arg0 : i32
    %4 = arith.index_cast %3 : i32 to index
    %c0 = arith.constant 0 : index
    %c0_2 = arith.constant 0 : index
    %5 = vector.load %arg9[%4, %c0, %c0_2] : memref<18x9x64xf32, #tpu.memory_space<vmem>>, vector<1x9x64xf32>
    %6 = vector.shape_cast %5 : vector<1x9x64xf32> to vector<9x64xf32>
    %cst = arith.constant 0.000000e+00 : f32
    %7 = vector.broadcast %cst : f32 to vector<3x128xf32>
    %8 = vector.extract_strided_slice %6 {offsets = [0, 0], sizes = [3, 64], strides = [1, 1]} : vector<9x64xf32> to vector<3x64xf32>
    %c0_3 = arith.constant 0 : index
    %c0_4 = arith.constant 0 : index
    %c0_5 = arith.constant 0 : index
    %9 = vector.load %arg5[%c0_3, %c0_4, %c0_5] : memref<5x64x128xf32, #tpu.memory_space<vmem>>, vector<1x64x128xf32>
    %10 = vector.shape_cast %9 : vector<1x64x128xf32> to vector<64x128xf32>
    %cst_6 = arith.constant dense<0.000000e+00> : vector<3x128xf32>
    %11 = tpu.matmul %8, %10, %cst_6 {dimension_numbers = #tpu.dot_dimension_numbers<[1], [0], [0], [1], [0, 0, 1, 1], [], []>} : vector<3x64xf32>, vector<64x128xf32>, vector<3x128xf32> -> vector<3x128xf32>
    %12 = arith.addf %7, %11 : vector<3x128xf32>
    %13 = vector.extract_strided_slice %6 {offsets = [5, 0], sizes = [3, 64], strides = [1, 1]} : vector<9x64xf32> to vector<3x64xf32>
    %c1 = arith.constant 1 : index
    %c0_7 = arith.constant 0 : index
    %c0_8 = arith.constant 0 : index
    %14 = vector.load %arg5[%c1, %c0_7, %c0_8] : memref<5x64x128xf32, #tpu.memory_space<vmem>>, vector<1x64x128xf32>
    %15 = vector.shape_cast %14 : vector<1x64x128xf32> to vector<64x128xf32>
    %cst_9 = arith.constant dense<0.000000e+00> : vector<3x128xf32>
    %16 = tpu.matmul %13, %15, %cst_9 {dimension_numbers = #tpu.dot_dimension_numbers<[1], [0], [0], [1], [0, 0, 1, 1], [], []>} : vector<3x64xf32>, vector<64x128xf32>, vector<3x128xf32> -> vector<3x128xf32>
    %17 = arith.addf %12, %16 : vector<3x128xf32>
    %18 = vector.extract_strided_slice %6 {offsets = [1, 0], sizes = [3, 64], strides = [1, 1]} : vector<9x64xf32> to vector<3x64xf32>
    %c2 = arith.constant 2 : index
    %c0_10 = arith.constant 0 : index
    %c0_11 = arith.constant 0 : index
    %19 = vector.load %arg5[%c2, %c0_10, %c0_11] : memref<5x64x128xf32, #tpu.memory_space<vmem>>, vector<1x64x128xf32>
    %20 = vector.shape_cast %19 : vector<1x64x128xf32> to vector<64x128xf32>
    %cst_12 = arith.constant dense<0.000000e+00> : vector<3x128xf32>
    %21 = tpu.matmul %18, %20, %cst_12 {dimension_numbers = #tpu.dot_dimension_numbers<[1], [0], [0], [1], [0, 0, 1, 1], [], []>} : vector<3x64xf32>, vector<64x128xf32>, vector<3x128xf32> -> vector<3x128xf32>
    %22 = arith.addf %17, %21 : vector<3x128xf32>
    %23 = vector.extract_strided_slice %6 {offsets = [6, 0], sizes = [3, 64], strides = [1, 1]} : vector<9x64xf32> to vector<3x64xf32>
    %c3 = arith.constant 3 : index
    %c0_13 = arith.constant 0 : index
    %c0_14 = arith.constant 0 : index
    %24 = vector.load %arg5[%c3, %c0_13, %c0_14] : memref<5x64x128xf32, #tpu.memory_space<vmem>>, vector<1x64x128xf32>
    %25 = vector.shape_cast %24 : vector<1x64x128xf32> to vector<64x128xf32>
    %cst_15 = arith.constant dense<0.000000e+00> : vector<3x128xf32>
    %26 = tpu.matmul %23, %25, %cst_15 {dimension_numbers = #tpu.dot_dimension_numbers<[1], [0], [0], [1], [0, 0, 1, 1], [], []>} : vector<3x64xf32>, vector<64x128xf32>, vector<3x128xf32> -> vector<3x128xf32>
    %27 = arith.addf %22, %26 : vector<3x128xf32>
    %28 = vector.extract_strided_slice %6 {offsets = [2, 0], sizes = [3, 64], strides = [1, 1]} : vector<9x64xf32> to vector<3x64xf32>
    %c4 = arith.constant 4 : index
    %c0_16 = arith.constant 0 : index
    %c0_17 = arith.constant 0 : index
    %29 = vector.load %arg5[%c4, %c0_16, %c0_17] : memref<5x64x128xf32, #tpu.memory_space<vmem>>, vector<1x64x128xf32>
    %30 = vector.shape_cast %29 : vector<1x64x128xf32> to vector<64x128xf32>
    %cst_18 = arith.constant dense<0.000000e+00> : vector<3x128xf32>
    %31 = tpu.matmul %28, %30, %cst_18 {dimension_numbers = #tpu.dot_dimension_numbers<[1], [0], [0], [1], [0, 0, 1, 1], [], []>} : vector<3x64xf32>, vector<64x128xf32>, vector<3x128xf32> -> vector<3x128xf32>
    %32 = arith.addf %27, %31 : vector<3x128xf32>
    %c0_19 = arith.constant 0 : index
    %c0_20 = arith.constant 0 : index
    %33 = vector.load %arg10[%c0_19, %c0_20] : memref<18x128xf32, #tpu.memory_space<vmem>>, vector<3x128xf32>
    %34 = arith.addf %33, %32 : vector<3x128xf32>
    %c0_21 = arith.constant 0 : index
    %c0_22 = arith.constant 0 : index
    %35 = vector.load %arg10[%c0_21, %c0_22] : memref<18x128xf32, #tpu.memory_space<vmem>>, vector<3x128xf32>
    tpu.vector_store %arg10[%c0_21, %c0_22], %34 {strides = array<i32>} : memref<18x128xf32, #tpu.memory_space<vmem>>, vector<3x128xf32>,
    %c2_i32 = arith.constant 2 : i32
    %36 = arith.addi %c2_i32, %arg0 : i32
    %37 = arith.index_cast %36 : i32 to index
    %c0_23 = arith.constant 0 : index
    %c0_24 = arith.constant 0 : index
    %38 = vector.load %arg9[%37, %c0_23, %c0_24] : memref<18x9x64xf32, #tpu.memory_space<vmem>>, vector<1x9x64xf32>
    %39 = vector.shape_cast %38 : vector<1x9x64xf32> to vector<9x64xf32>
    %cst_25 = arith.constant 0.000000e+00 : f32
    %40 = vector.broadcast %cst_25 : f32 to vector<3x128xf32>
    %41 = vector.extract_strided_slice %39 {offsets = [0, 0], sizes = [3, 64], strides = [1, 1]} : vector<9x64xf32> to vector<3x64xf32>
    %c0_26 = arith.constant 0 : index
    %c0_27 = arith.constant 0 : index
    %c0_28 = arith.constant 0 : index
    %42 = vector.load %arg5[%c0_26, %c0_27, %c0_28] : memref<5x64x128xf32, #tpu.memory_space<vmem>>, vector<1x64x128xf32>
    %43 = vector.shape_cast %42 : vector<1x64x128xf32> to vector<64x128xf32>
    %cst_29 = arith.constant dense<0.000000e+00> : vector<3x128xf32>
    %44 = tpu.matmul %41, %43, %cst_29 {dimension_numbers = #tpu.dot_dimension_numbers<[1], [0], [0], [1], [0, 0, 1, 1], [], []>} : vector<3x64xf32>, vector<64x128xf32>, vector<3x128xf32> -> vector<3x128xf32>
    %45 = arith.addf %40, %44 : vector<3x128xf32>
    %46 = vector.extract_strided_slice %39 {offsets = [5, 0], sizes = [3, 64], strides = [1, 1]} : vector<9x64xf32> to vector<3x64xf32>
    %c1_30 = arith.constant 1 : index
    %c0_31 = arith.constant 0 : index
    %c0_32 = arith.constant 0 : index
    %47 = vector.load %arg5[%c1_30, %c0_31, %c0_32] : memref<5x64x128xf32, #tpu.memory_space<vmem>>, vector<1x64x128xf32>
    %48 = vector.shape_cast %47 : vector<1x64x128xf32> to vector<64x128xf32>
    %cst_33 = arith.constant dense<0.000000e+00> : vector<3x128xf32>
    %49 = tpu.matmul %46, %48, %cst_33 {dimension_numbers = #tpu.dot_dimension_numbers<[1], [0], [0], [1], [0, 0, 1, 1], [], []>} : vector<3x64xf32>, vector<64x128xf32>, vector<3x128xf32> -> vector<3x128xf32>
    %50 = arith.addf %45, %49 : vector<3x128xf32>
    %51 = vector.extract_strided_slice %39 {offsets = [1, 0], sizes = [3, 64], strides = [1, 1]} : vector<9x64xf32> to vector<3x64xf32>
    %c2_34 = arith.constant 2 : index
    %c0_35 = arith.constant 0 : index
    %c0_36 = arith.constant 0 : index
    %52 = vector.load %arg5[%c2_34, %c0_35, %c0_36] : memref<5x64x128xf32, #tpu.memory_space<vmem>>, vector<1x64x128xf32>
    %53 = vector.shape_cast %52 : vector<1x64x128xf32> to vector<64x128xf32>
    %cst_37 = arith.constant dense<0.000000e+00> : vector<3x128xf32>
    %54 = tpu.matmul %51, %53, %cst_37 {dimension_numbers = #tpu.dot_dimension_numbers<[1], [0], [0], [1], [0, 0, 1, 1], [], []>} : vector<3x64xf32>, vector<64x128xf32>, vector<3x128xf32> -> vector<3x128xf32>
    %55 = arith.addf %50, %54 : vector<3x128xf32>
    %56 = vector.extract_strided_slice %39 {offsets = [6, 0], sizes = [3, 64], strides = [1, 1]} : vector<9x64xf32> to vector<3x64xf32>
    %c3_38 = arith.constant 3 : index
    %c0_39 = arith.constant 0 : index
    %c0_40 = arith.constant 0 : index
    %57 = vector.load %arg5[%c3_38, %c0_39, %c0_40] : memref<5x64x128xf32, #tpu.memory_space<vmem>>, vector<1x64x128xf32>
    %58 = vector.shape_cast %57 : vector<1x64x128xf32> to vector<64x128xf32>
    %cst_41 = arith.constant dense<0.000000e+00> : vector<3x128xf32>
    %59 = tpu.matmul %56, %58, %cst_41 {dimension_numbers = #tpu.dot_dimension_numbers<[1], [0], [0], [1], [0, 0, 1, 1], [], []>} : vector<3x64xf32>, vector<64x128xf32>, vector<3x128xf32> -> vector<3x128xf32>
    %60 = arith.addf %55, %59 : vector<3x128xf32>
    %61 = vector.extract_strided_slice %39 {offsets = [2, 0], sizes = [3, 64], strides = [1, 1]} : vector<9x64xf32> to vector<3x64xf32>
    %c4_42 = arith.constant 4 : index
    %c0_43 = arith.constant 0 : index
    %c0_44 = arith.constant 0 : index
    %62 = vector.load %arg5[%c4_42, %c0_43, %c0_44] : memref<5x64x128xf32, #tpu.memory_space<vmem>>, vector<1x64x128xf32>
    %63 = vector.shape_cast %62 : vector<1x64x128xf32> to vector<64x128xf32>
    %cst_45 = arith.constant dense<0.000000e+00> : vector<3x128xf32>
    %64 = tpu.matmul %61, %63, %cst_45 {dimension_numbers = #tpu.dot_dimension_numbers<[1], [0], [0], [1], [0, 0, 1, 1], [], []>} : vector<3x64xf32>, vector<64x128xf32>, vector<3x128xf32> -> vector<3x128xf32>
    %65 = arith.addf %60, %64 : vector<3x128xf32>
    %c3_46 = arith.constant 3 : index
    %c0_47 = arith.constant 0 : index
    %66 = vector.load %arg10[%c3_46, %c0_47] : memref<18x128xf32, #tpu.memory_space<vmem>>, vector<3x128xf32>
    %67 = arith.addf %66, %65 : vector<3x128xf32>
    %c3_48 = arith.constant 3 : index
    %c0_49 = arith.constant 0 : index
    %68 = vector.load %arg10[%c3_48, %c0_49] : memref<18x128xf32, #tpu.memory_space<vmem>>, vector<3x128xf32>
    tpu.vector_store %arg10[%c3_48, %c0_49], %67 {strides = array<i32>} : memref<18x128xf32, #tpu.memory_space<vmem>>, vector<3x128xf32>,
    %c4_i32 = arith.constant 4 : i32
    %69 = arith.addi %c4_i32, %arg0 : i32
    %70 = arith.index_cast %69 : i32 to index
    %c0_50 = arith.constant 0 : index
    %c0_51 = arith.constant 0 : index
    %71 = vector.load %arg9[%70, %c0_50, %c0_51] : memref<18x9x64xf32, #tpu.memory_space<vmem>>, vector<1x9x64xf32>
    %72 = vector.shape_cast %71 : vector<1x9x64xf32> to vector<9x64xf32>
    %cst_52 = arith.constant 0.000000e+00 : f32
    %73 = vector.broadcast %cst_52 : f32 to vector<3x128xf32>
    %74 = vector.extract_strided_slice %72 {offsets = [0, 0], sizes = [3, 64], strides = [1, 1]} : vector<9x64xf32> to vector<3x64xf32>
    %c0_53 = arith.constant 0 : index
    %c0_54 = arith.constant 0 : index
    %c0_55 = arith.constant 0 : index
    %75 = vector.load %arg5[%c0_53, %c0_54, %c0_55] : memref<5x64x128xf32, #tpu.memory_space<vmem>>, vector<1x64x128xf32>
    %76 = vector.shape_cast %75 : vector<1x64x128xf32> to vector<64x128xf32>
    %cst_56 = arith.constant dense<0.000000e+00> : vector<3x128xf32>
    %77 = tpu.matmul %74, %76, %cst_56 {dimension_numbers = #tpu.dot_dimension_numbers<[1], [0], [0], [1], [0, 0, 1, 1], [], []>} : vector<3x64xf32>, vector<64x128xf32>, vector<3x128xf32> -> vector<3x128xf32>
    %78 = arith.addf %73, %77 : vector<3x128xf32>
    %79 = vector.extract_strided_slice %72 {offsets = [5, 0], sizes = [3, 64], strides = [1, 1]} : vector<9x64xf32> to vector<3x64xf32>
    %c1_57 = arith.constant 1 : index
    %c0_58 = arith.constant 0 : index
    %c0_59 = arith.constant 0 : index
    %80 = vector.load %arg5[%c1_57, %c0_58, %c0_59] : memref<5x64x128xf32, #tpu.memory_space<vmem>>, vector<1x64x128xf32>
    %81 = vector.shape_cast %80 : vector<1x64x128xf32> to vector<64x128xf32>
    %cst_60 = arith.constant dense<0.000000e+00> : vector<3x128xf32>
    %82 = tpu.matmul %79, %81, %cst_60 {dimension_numbers = #tpu.dot_dimension_numbers<[1], [0], [0], [1], [0, 0, 1, 1], [], []>} : vector<3x64xf32>, vector<64x128xf32>, vector<3x128xf32> -> vector<3x128xf32>
    %83 = arith.addf %78, %82 : vector<3x128xf32>
    %84 = vector.extract_strided_slice %72 {offsets = [1, 0], sizes = [3, 64], strides = [1, 1]} : vector<9x64xf32> to vector<3x64xf32>
    %c2_61 = arith.constant 2 : index
    %c0_62 = arith.constant 0 : index
    %c0_63 = arith.constant 0 : index
    %85 = vector.load %arg5[%c2_61, %c0_62, %c0_63] : memref<5x64x128xf32, #tpu.memory_space<vmem>>, vector<1x64x128xf32>
    %86 = vector.shape_cast %85 : vector<1x64x128xf32> to vector<64x128xf32>
    %cst_64 = arith.constant dense<0.000000e+00> : vector<3x128xf32>
    %87 = tpu.matmul %84, %86, %cst_64 {dimension_numbers = #tpu.dot_dimension_numbers<[1], [0], [0], [1], [0, 0, 1, 1], [], []>} : vector<3x64xf32>, vector<64x128xf32>, vector<3x128xf32> -> vector<3x128xf32>
    %88 = arith.addf %83, %87 : vector<3x128xf32>
    %89 = vector.extract_strided_slice %72 {offsets = [6, 0], sizes = [3, 64], strides = [1, 1]} : vector<9x64xf32> to vector<3x64xf32>
    %c3_65 = arith.constant 3 : index
    %c0_66 = arith.constant 0 : index
    %c0_67 = arith.constant 0 : index
    %90 = vector.load %arg5[%c3_65, %c0_66, %c0_67] : memref<5x64x128xf32, #tpu.memory_space<vmem>>, vector<1x64x128xf32>
    %91 = vector.shape_cast %90 : vector<1x64x128xf32> to vector<64x128xf32>
    %cst_68 = arith.constant dense<0.000000e+00> : vector<3x128xf32>
    %92 = tpu.matmul %89, %91, %cst_68 {dimension_numbers = #tpu.dot_dimension_numbers<[1], [0], [0], [1], [0, 0, 1, 1], [], []>} : vector<3x64xf32>, vector<64x128xf32>, vector<3x128xf32> -> vector<3x128xf32>
    %93 = arith.addf %88, %92 : vector<3x128xf32>
    %94 = vector.extract_strided_slice %72 {offsets = [2, 0], sizes = [3, 64], strides = [1, 1]} : vector<9x64xf32> to vector<3x64xf32>
    %c4_69 = arith.constant 4 : index
    %c0_70 = arith.constant 0 : index
    %c0_71 = arith.constant 0 : index
    %95 = vector.load %arg5[%c4_69, %c0_70, %c0_71] : memref<5x64x128xf32, #tpu.memory_space<vmem>>, vector<1x64x128xf32>
    %96 = vector.shape_cast %95 : vector<1x64x128xf32> to vector<64x128xf32>
    %cst_72 = arith.constant dense<0.000000e+00> : vector<3x128xf32>
    %97 = tpu.matmul %94, %96, %cst_72 {dimension_numbers = #tpu.dot_dimension_numbers<[1], [0], [0], [1], [0, 0, 1, 1], [], []>} : vector<3x64xf32>, vector<64x128xf32>, vector<3x128xf32> -> vector<3x128xf32>
    %98 = arith.addf %93, %97 : vector<3x128xf32>
    %c6 = arith.constant 6 : index
    %c0_73 = arith.constant 0 : index
    %99 = vector.load %arg10[%c6, %c0_73] : memref<18x128xf32, #tpu.memory_space<vmem>>, vector<3x128xf32>
    %100 = arith.addf %99, %98 : vector<3x128xf32>
    %c6_74 = arith.constant 6 : index
    %c0_75 = arith.constant 0 : index
    %101 = vector.load %arg10[%c6_74, %c0_75] : memref<18x128xf32, #tpu.memory_space<vmem>>, vector<3x128xf32>
    tpu.vector_store %arg10[%c6_74, %c0_75], %100 {strides = array<i32>} : memref<18x128xf32, #tpu.memory_space<vmem>>, vector<3x128xf32>,
    %c9_i32 = arith.constant 9 : i32
    %102 = arith.addi %c9_i32, %arg0 : i32
    %103 = arith.index_cast %102 : i32 to index
    %c0_76 = arith.constant 0 : index
    %c0_77 = arith.constant 0 : index
    %104 = vector.load %arg9[%103, %c0_76, %c0_77] : memref<18x9x64xf32, #tpu.memory_space<vmem>>, vector<1x9x64xf32>
    %105 = vector.shape_cast %104 : vector<1x9x64xf32> to vector<9x64xf32>
    %cst_78 = arith.constant 0.000000e+00 : f32
    %106 = vector.broadcast %cst_78 : f32 to vector<3x128xf32>
    %107 = vector.extract_strided_slice %105 {offsets = [0, 0], sizes = [3, 64], strides = [1, 1]} : vector<9x64xf32> to vector<3x64xf32>
    %c0_79 = arith.constant 0 : index
    %c0_80 = arith.constant 0 : index
    %c0_81 = arith.constant 0 : index
    %108 = vector.load %arg5[%c0_79, %c0_80, %c0_81] : memref<5x64x128xf32, #tpu.memory_space<vmem>>, vector<1x64x128xf32>
    %109 = vector.shape_cast %108 : vector<1x64x128xf32> to vector<64x128xf32>
    %cst_82 = arith.constant dense<0.000000e+00> : vector<3x128xf32>
    %110 = tpu.matmul %107, %109, %cst_82 {dimension_numbers = #tpu.dot_dimension_numbers<[1], [0], [0], [1], [0, 0, 1, 1], [], []>} : vector<3x64xf32>, vector<64x128xf32>, vector<3x128xf32> -> vector<3x128xf32>
    %111 = arith.addf %106, %110 : vector<3x128xf32>
    %112 = vector.extract_strided_slice %105 {offsets = [5, 0], sizes = [3, 64], strides = [1, 1]} : vector<9x64xf32> to vector<3x64xf32>
    %c1_83 = arith.constant 1 : index
    %c0_84 = arith.constant 0 : index
    %c0_85 = arith.constant 0 : index
    %113 = vector.load %arg5[%c1_83, %c0_84, %c0_85] : memref<5x64x128xf32, #tpu.memory_space<vmem>>, vector<1x64x128xf32>
    %114 = vector.shape_cast %113 : vector<1x64x128xf32> to vector<64x128xf32>
    %cst_86 = arith.constant dense<0.000000e+00> : vector<3x128xf32>
    %115 = tpu.matmul %112, %114, %cst_86 {dimension_numbers = #tpu.dot_dimension_numbers<[1], [0], [0], [1], [0, 0, 1, 1], [], []>} : vector<3x64xf32>, vector<64x128xf32>, vector<3x128xf32> -> vector<3x128xf32>
    %116 = arith.addf %111, %115 : vector<3x128xf32>
    %117 = vector.extract_strided_slice %105 {offsets = [1, 0], sizes = [3, 64], strides = [1, 1]} : vector<9x64xf32> to vector<3x64xf32>
    %c2_87 = arith.constant 2 : index
    %c0_88 = arith.constant 0 : index
    %c0_89 = arith.constant 0 : index
    %118 = vector.load %arg5[%c2_87, %c0_88, %c0_89] : memref<5x64x128xf32, #tpu.memory_space<vmem>>, vector<1x64x128xf32>
    %119 = vector.shape_cast %118 : vector<1x64x128xf32> to vector<64x128xf32>
    %cst_90 = arith.constant dense<0.000000e+00> : vector<3x128xf32>
    %120 = tpu.matmul %117, %119, %cst_90 {dimension_numbers = #tpu.dot_dimension_numbers<[1], [0], [0], [1], [0, 0, 1, 1], [], []>} : vector<3x64xf32>, vector<64x128xf32>, vector<3x128xf32> -> vector<3x128xf32>
    %121 = arith.addf %116, %120 : vector<3x128xf32>
    %122 = vector.extract_strided_slice %105 {offsets = [6, 0], sizes = [3, 64], strides = [1, 1]} : vector<9x64xf32> to vector<3x64xf32>
    %c3_91 = arith.constant 3 : index
    %c0_92 = arith.constant 0 : index
    %c0_93 = arith.constant 0 : index
    %123 = vector.load %arg5[%c3_91, %c0_92, %c0_93] : memref<5x64x128xf32, #tpu.memory_space<vmem>>, vector<1x64x128xf32>
    %124 = vector.shape_cast %123 : vector<1x64x128xf32> to vector<64x128xf32>
    %cst_94 = arith.constant dense<0.000000e+00> : vector<3x128xf32>
    %125 = tpu.matmul %122, %124, %cst_94 {dimension_numbers = #tpu.dot_dimension_numbers<[1], [0], [0], [1], [0, 0, 1, 1], [], []>} : vector<3x64xf32>, vector<64x128xf32>, vector<3x128xf32> -> vector<3x128xf32>
    %126 = arith.addf %121, %125 : vector<3x128xf32>
    %127 = vector.extract_strided_slice %105 {offsets = [2, 0], sizes = [3, 64], strides = [1, 1]} : vector<9x64xf32> to vector<3x64xf32>
    %c4_95 = arith.constant 4 : index
    %c0_96 = arith.constant 0 : index
    %c0_97 = arith.constant 0 : index
    %128 = vector.load %arg5[%c4_95, %c0_96, %c0_97] : memref<5x64x128xf32, #tpu.memory_space<vmem>>, vector<1x64x128xf32>
    %129 = vector.shape_cast %128 : vector<1x64x128xf32> to vector<64x128xf32>
    %cst_98 = arith.constant dense<0.000000e+00> : vector<3x128xf32>
    %130 = tpu.matmul %127, %129, %cst_98 {dimension_numbers = #tpu.dot_dimension_numbers<[1], [0], [0], [1], [0, 0, 1, 1], [], []>} : vector<3x64xf32>, vector<64x128xf32>, vector<3x128xf32> -> vector<3x128xf32>
    %131 = arith.addf %126, %130 : vector<3x128xf32>
    %c9 = arith.constant 9 : index
    %c0_99 = arith.constant 0 : index
    %132 = vector.load %arg10[%c9, %c0_99] : memref<18x128xf32, #tpu.memory_space<vmem>>, vector<3x128xf32>
    %133 = arith.addf %132, %131 : vector<3x128xf32>
    %c9_100 = arith.constant 9 : index
    %c0_101 = arith.constant 0 : index
    %134 = vector.load %arg10[%c9_100, %c0_101] : memref<18x128xf32, #tpu.memory_space<vmem>>, vector<3x128xf32>
    tpu.vector_store %arg10[%c9_100, %c0_101], %133 {strides = array<i32>} : memref<18x128xf32, #tpu.memory_space<vmem>>, vector<3x128xf32>,
    %c11_i32 = arith.constant 11 : i32
    %135 = arith.addi %c11_i32, %arg0 : i32
    %136 = arith.index_cast %135 : i32 to index
    %c0_102 = arith.constant 0 : index
    %c0_103 = arith.constant 0 : index
    %137 = vector.load %arg9[%136, %c0_102, %c0_103] : memref<18x9x64xf32, #tpu.memory_space<vmem>>, vector<1x9x64xf32>
    %138 = vector.shape_cast %137 : vector<1x9x64xf32> to vector<9x64xf32>
    %cst_104 = arith.constant 0.000000e+00 : f32
    %139 = vector.broadcast %cst_104 : f32 to vector<3x128xf32>
    %140 = vector.extract_strided_slice %138 {offsets = [0, 0], sizes = [3, 64], strides = [1, 1]} : vector<9x64xf32> to vector<3x64xf32>
    %c0_105 = arith.constant 0 : index
    %c0_106 = arith.constant 0 : index
    %c0_107 = arith.constant 0 : index
    %141 = vector.load %arg5[%c0_105, %c0_106, %c0_107] : memref<5x64x128xf32, #tpu.memory_space<vmem>>, vector<1x64x128xf32>
    %142 = vector.shape_cast %141 : vector<1x64x128xf32> to vector<64x128xf32>
    %cst_108 = arith.constant dense<0.000000e+00> : vector<3x128xf32>
    %143 = tpu.matmul %140, %142, %cst_108 {dimension_numbers = #tpu.dot_dimension_numbers<[1], [0], [0], [1], [0, 0, 1, 1], [], []>} : vector<3x64xf32>, vector<64x128xf32>, vector<3x128xf32> -> vector<3x128xf32>
    %144 = arith.addf %139, %143 : vector<3x128xf32>
    %145 = vector.extract_strided_slice %138 {offsets = [5, 0], sizes = [3, 64], strides = [1, 1]} : vector<9x64xf32> to vector<3x64xf32>
    %c1_109 = arith.constant 1 : index
    %c0_110 = arith.constant 0 : index
    %c0_111 = arith.constant 0 : index
    %146 = vector.load %arg5[%c1_109, %c0_110, %c0_111] : memref<5x64x128xf32, #tpu.memory_space<vmem>>, vector<1x64x128xf32>
    %147 = vector.shape_cast %146 : vector<1x64x128xf32> to vector<64x128xf32>
    %cst_112 = arith.constant dense<0.000000e+00> : vector<3x128xf32>
    %148 = tpu.matmul %145, %147, %cst_112 {dimension_numbers = #tpu.dot_dimension_numbers<[1], [0], [0], [1], [0, 0, 1, 1], [], []>} : vector<3x64xf32>, vector<64x128xf32>, vector<3x128xf32> -> vector<3x128xf32>
    %149 = arith.addf %144, %148 : vector<3x128xf32>
    %150 = vector.extract_strided_slice %138 {offsets = [1, 0], sizes = [3, 64], strides = [1, 1]} : vector<9x64xf32> to vector<3x64xf32>
    %c2_113 = arith.constant 2 : index
    %c0_114 = arith.constant 0 : index
    %c0_115 = arith.constant 0 : index
    %151 = vector.load %arg5[%c2_113, %c0_114, %c0_115] : memref<5x64x128xf32, #tpu.memory_space<vmem>>, vector<1x64x128xf32>
    %152 = vector.shape_cast %151 : vector<1x64x128xf32> to vector<64x128xf32>
    %cst_116 = arith.constant dense<0.000000e+00> : vector<3x128xf32>
    %153 = tpu.matmul %150, %152, %cst_116 {dimension_numbers = #tpu.dot_dimension_numbers<[1], [0], [0], [1], [0, 0, 1, 1], [], []>} : vector<3x64xf32>, vector<64x128xf32>, vector<3x128xf32> -> vector<3x128xf32>
    %154 = arith.addf %149, %153 : vector<3x128xf32>
    %155 = vector.extract_strided_slice %138 {offsets = [6, 0], sizes = [3, 64], strides = [1, 1]} : vector<9x64xf32> to vector<3x64xf32>
    %c3_117 = arith.constant 3 : index
    %c0_118 = arith.constant 0 : index
    %c0_119 = arith.constant 0 : index
    %156 = vector.load %arg5[%c3_117, %c0_118, %c0_119] : memref<5x64x128xf32, #tpu.memory_space<vmem>>, vector<1x64x128xf32>
    %157 = vector.shape_cast %156 : vector<1x64x128xf32> to vector<64x128xf32>
    %cst_120 = arith.constant dense<0.000000e+00> : vector<3x128xf32>
    %158 = tpu.matmul %155, %157, %cst_120 {dimension_numbers = #tpu.dot_dimension_numbers<[1], [0], [0], [1], [0, 0, 1, 1], [], []>} : vector<3x64xf32>, vector<64x128xf32>, vector<3x128xf32> -> vector<3x128xf32>
    %159 = arith.addf %154, %158 : vector<3x128xf32>
    %160 = vector.extract_strided_slice %138 {offsets = [2, 0], sizes = [3, 64], strides = [1, 1]} : vector<9x64xf32> to vector<3x64xf32>
    %c4_121 = arith.constant 4 : index
    %c0_122 = arith.constant 0 : index
    %c0_123 = arith.constant 0 : index
    %161 = vector.load %arg5[%c4_121, %c0_122, %c0_123] : memref<5x64x128xf32, #tpu.memory_space<vmem>>, vector<1x64x128xf32>
    %162 = vector.shape_cast %161 : vector<1x64x128xf32> to vector<64x128xf32>
    %cst_124 = arith.constant dense<0.000000e+00> : vector<3x128xf32>
    %163 = tpu.matmul %160, %162, %cst_124 {dimension_numbers = #tpu.dot_dimension_numbers<[1], [0], [0], [1], [0, 0, 1, 1], [], []>} : vector<3x64xf32>, vector<64x128xf32>, vector<3x128xf32> -> vector<3x128xf32>
    %164 = arith.addf %159, %163 : vector<3x128xf32>
    %c12 = arith.constant 12 : index
    %c0_125 = arith.constant 0 : index
    %165 = vector.load %arg10[%c12, %c0_125] : memref<18x128xf32, #tpu.memory_space<vmem>>, vector<3x128xf32>
    %166 = arith.addf %165, %164 : vector<3x128xf32>
    %c12_126 = arith.constant 12 : index
    %c0_127 = arith.constant 0 : index
    %167 = vector.load %arg10[%c12_126, %c0_127] : memref<18x128xf32, #tpu.memory_space<vmem>>, vector<3x128xf32>
    tpu.vector_store %arg10[%c12_126, %c0_127], %166 {strides = array<i32>} : memref<18x128xf32, #tpu.memory_space<vmem>>, vector<3x128xf32>,
    %c13_i32 = arith.constant 13 : i32
    %168 = arith.addi %c13_i32, %arg0 : i32
    %169 = arith.index_cast %168 : i32 to index
    %c0_128 = arith.constant 0 : index
    %c0_129 = arith.constant 0 : index
    %170 = vector.load %arg9[%169, %c0_128, %c0_129] : memref<18x9x64xf32, #tpu.memory_space<vmem>>, vector<1x9x64xf32>
    %171 = vector.shape_cast %170 : vector<1x9x64xf32> to vector<9x64xf32>
    %cst_130 = arith.constant 0.000000e+00 : f32
    %172 = vector.broadcast %cst_130 : f32 to vector<3x128xf32>
    %173 = vector.extract_strided_slice %171 {offsets = [0, 0], sizes = [3, 64], strides = [1, 1]} : vector<9x64xf32> to vector<3x64xf32>
    %c0_131 = arith.constant 0 : index
    %c0_132 = arith.constant 0 : index
    %c0_133 = arith.constant 0 : index
    %174 = vector.load %arg5[%c0_131, %c0_132, %c0_133] : memref<5x64x128xf32, #tpu.memory_space<vmem>>, vector<1x64x128xf32>
    %175 = vector.shape_cast %174 : vector<1x64x128xf32> to vector<64x128xf32>
    %cst_134 = arith.constant dense<0.000000e+00> : vector<3x128xf32>
    %176 = tpu.matmul %173, %175, %cst_134 {dimension_numbers = #tpu.dot_dimension_numbers<[1], [0], [0], [1], [0, 0, 1, 1], [], []>} : vector<3x64xf32>, vector<64x128xf32>, vector<3x128xf32> -> vector<3x128xf32>
    %177 = arith.addf %172, %176 : vector<3x128xf32>
    %178 = vector.extract_strided_slice %171 {offsets = [5, 0], sizes = [3, 64], strides = [1, 1]} : vector<9x64xf32> to vector<3x64xf32>
    %c1_135 = arith.constant 1 : index
    %c0_136 = arith.constant 0 : index
    %c0_137 = arith.constant 0 : index
    %179 = vector.load %arg5[%c1_135, %c0_136, %c0_137] : memref<5x64x128xf32, #tpu.memory_space<vmem>>, vector<1x64x128xf32>
    %180 = vector.shape_cast %179 : vector<1x64x128xf32> to vector<64x128xf32>
    %cst_138 = arith.constant dense<0.000000e+00> : vector<3x128xf32>
    %181 = tpu.matmul %178, %180, %cst_138 {dimension_numbers = #tpu.dot_dimension_numbers<[1], [0], [0], [1], [0, 0, 1, 1], [], []>} : vector<3x64xf32>, vector<64x128xf32>, vector<3x128xf32> -> vector<3x128xf32>
    %182 = arith.addf %177, %181 : vector<3x128xf32>
    %183 = vector.extract_strided_slice %171 {offsets = [1, 0], sizes = [3, 64], strides = [1, 1]} : vector<9x64xf32> to vector<3x64xf32>
    %c2_139 = arith.constant 2 : index
    %c0_140 = arith.constant 0 : index
    %c0_141 = arith.constant 0 : index
    %184 = vector.load %arg5[%c2_139, %c0_140, %c0_141] : memref<5x64x128xf32, #tpu.memory_space<vmem>>, vector<1x64x128xf32>
    %185 = vector.shape_cast %184 : vector<1x64x128xf32> to vector<64x128xf32>
    %cst_142 = arith.constant dense<0.000000e+00> : vector<3x128xf32>
    %186 = tpu.matmul %183, %185, %cst_142 {dimension_numbers = #tpu.dot_dimension_numbers<[1], [0], [0], [1], [0, 0, 1, 1], [], []>} : vector<3x64xf32>, vector<64x128xf32>, vector<3x128xf32> -> vector<3x128xf32>
    %187 = arith.addf %182, %186 : vector<3x128xf32>
    %188 = vector.extract_strided_slice %171 {offsets = [6, 0], sizes = [3, 64], strides = [1, 1]} : vector<9x64xf32> to vector<3x64xf32>
    %c3_143 = arith.constant 3 : index
    %c0_144 = arith.constant 0 : index
    %c0_145 = arith.constant 0 : index
    %189 = vector.load %arg5[%c3_143, %c0_144, %c0_145] : memref<5x64x128xf32, #tpu.memory_space<vmem>>, vector<1x64x128xf32>
    %190 = vector.shape_cast %189 : vector<1x64x128xf32> to vector<64x128xf32>
    %cst_146 = arith.constant dense<0.000000e+00> : vector<3x128xf32>
    %191 = tpu.matmul %188, %190, %cst_146 {dimension_numbers = #tpu.dot_dimension_numbers<[1], [0], [0], [1], [0, 0, 1, 1], [], []>} : vector<3x64xf32>, vector<64x128xf32>, vector<3x128xf32> -> vector<3x128xf32>
    %192 = arith.addf %187, %191 : vector<3x128xf32>
    %193 = vector.extract_strided_slice %171 {offsets = [2, 0], sizes = [3, 64], strides = [1, 1]} : vector<9x64xf32> to vector<3x64xf32>
    %c4_147 = arith.constant 4 : index
    %c0_148 = arith.constant 0 : index
    %c0_149 = arith.constant 0 : index
    %194 = vector.load %arg5[%c4_147, %c0_148, %c0_149] : memref<5x64x128xf32, #tpu.memory_space<vmem>>, vector<1x64x128xf32>
    %195 = vector.shape_cast %194 : vector<1x64x128xf32> to vector<64x128xf32>
    %cst_150 = arith.constant dense<0.000000e+00> : vector<3x128xf32>
    %196 = tpu.matmul %193, %195, %cst_150 {dimension_numbers = #tpu.dot_dimension_numbers<[1], [0], [0], [1], [0, 0, 1, 1], [], []>} : vector<3x64xf32>, vector<64x128xf32>, vector<3x128xf32> -> vector<3x128xf32>
    %197 = arith.addf %192, %196 : vector<3x128xf32>
    %c15 = arith.constant 15 : index
    %c0_151 = arith.constant 0 : index
    %198 = vector.load %arg10[%c15, %c0_151] : memref<18x128xf32, #tpu.memory_space<vmem>>, vector<3x128xf32>
    %199 = arith.addf %198, %197 : vector<3x128xf32>
    %c15_152 = arith.constant 15 : index
    %c0_153 = arith.constant 0 : index
    %200 = vector.load %arg10[%c15_152, %c0_153] : memref<18x128xf32, #tpu.memory_space<vmem>>, vector<3x128xf32>
    tpu.vector_store %arg10[%c15_152, %c0_153], %199 {strides = array<i32>} : memref<18x128xf32, #tpu.memory_space<vmem>>, vector<3x128xf32>,
    %c4_i32_154 = arith.constant 4 : i32
    %201 = arith.cmpi eq, %arg0, %c4_i32_154 : i32
    %202 = arith.extui %201 : i1 to i32
    %c0_i32_155 = arith.constant 0 : i32
    %203 = arith.cmpi ne, %202, %c0_i32_155 : i32
    scf.if %203 {
      %c0_156 = arith.constant 0 : index
      %c0_157 = arith.constant 0 : index
      %204 = vector.load %arg10[%c0_156, %c0_157] : memref<18x128xf32, #tpu.memory_space<vmem>>, vector<18x128xf32>
      %cst_158 = arith.constant dense<0.000000e+00> : vector<128xf32>
      %205 = vector.multi_reduction <add>, %204, %cst_158 [0] : vector<18x128xf32> to vector<128xf32>
      %206 = vector.shape_cast %205 : vector<128xf32> to vector<1x128xf32>
      %cst_159 = arith.constant 0.055555556 : f32
      %207 = vector.broadcast %cst_159 : f32 to vector<1x128xf32>
      %208 = arith.mulf %206, %207 : vector<1x128xf32>
      %209 = vector.broadcast %208 : vector<1x128xf32> to vector<18x128xf32>
      %210 = arith.subf %204, %209 : vector<18x128xf32>
      %211 = arith.mulf %210, %210 : vector<18x128xf32>
      %cst_160 = arith.constant dense<0.000000e+00> : vector<128xf32>
      %212 = vector.multi_reduction <add>, %211, %cst_160 [0] : vector<18x128xf32> to vector<128xf32>
      %213 = vector.shape_cast %212 : vector<128xf32> to vector<1x128xf32>
      %cst_161 = arith.constant 0.055555556 : f32
      %214 = vector.broadcast %cst_161 : f32 to vector<1x128xf32>
      %215 = arith.mulf %213, %214 : vector<1x128xf32>
      %cst_162 = arith.constant 9.99999974E-6 : f32
      %216 = vector.broadcast %cst_162 : f32 to vector<1x128xf32>
      %217 = arith.addf %215, %216 : vector<1x128xf32>
      %218 = math.rsqrt %217 : vector<1x128xf32>
      %c0_163 = arith.constant 0 : index
      %c0_164 = arith.constant 0 : index
      %219 = vector.load %arg6[%c0_163, %c0_164] : memref<1x128xf32, #tpu.memory_space<vmem>>, vector<1x128xf32>
      %220 = arith.mulf %218, %219 : vector<1x128xf32>
      %c0_165 = arith.constant 0 : index
      %c0_166 = arith.constant 0 : index
      %221 = vector.load %arg7[%c0_165, %c0_166] : memref<1x128xf32, #tpu.memory_space<vmem>>, vector<1x128xf32>
      %222 = arith.mulf %208, %220 : vector<1x128xf32>
      %223 = arith.subf %221, %222 : vector<1x128xf32>
      %224 = vector.broadcast %220 : vector<1x128xf32> to vector<18x128xf32>
      %225 = arith.mulf %204, %224 : vector<18x128xf32>
      %226 = vector.broadcast %223 : vector<1x128xf32> to vector<18x128xf32>
      %227 = arith.addf %225, %226 : vector<18x128xf32>
      %cst_167 = arith.constant 0.000000e+00 : f32
      %228 = vector.broadcast %cst_167 : f32 to vector<18x128xf32>
      %229 = arith.maximumf %227, %228 : vector<18x128xf32>
      %c0_168 = arith.constant 0 : index
      %c0_169 = arith.constant 0 : index
      %230 = vector.load %arg8[%c0_168, %c0_169] : memref<18x128xf32, #tpu.memory_space<vmem>>, vector<18x128xf32>
      tpu.vector_store %arg8[%c0_168, %c0_169], %229 {strides = array<i32>} : memref<18x128xf32, #tpu.memory_space<vmem>>, vector<18x128xf32>,
    } else {
    }
    return
  }
  func.func @transform_0(%arg0: i32) -> (i32, i32) {
    %c0_i32 = arith.constant 0 : i32
    %c0_i32_0 = arith.constant 0 : i32
    %c0_i32_1 = arith.constant 0 : i32
    return %c0_i32, %c0_i32_0 : i32, i32
  }
  func.func @transform_1(%arg0: i32) -> (i32, i32) {
    %c0_i32 = arith.constant 0 : i32
    %c0_i32_0 = arith.constant 0 : i32
    %c0_i32_1 = arith.constant 0 : i32
    return %c0_i32, %c0_i32_0 : i32, i32
  }
  func.func @transform_2(%arg0: i32) -> (i32, i32) {
    %c0_i32 = arith.constant 0 : i32
    %c0_i32_0 = arith.constant 0 : i32
    %c0_i32_1 = arith.constant 0 : i32
    return %c0_i32, %c0_i32_0 : i32, i32
  }
  func.func @transform_3(%arg0: i32) -> (i32, i32) {
    %c0_i32 = arith.constant 0 : i32
    %c0_i32_0 = arith.constant 0 : i32
    %c0_i32_1 = arith.constant 0 : i32
    return %c0_i32, %c0_i32_0 : i32, i32
  }
  func.func @transform_4(%arg0: i32) -> (i32, i32, i32) {
    %c0_i32 = arith.constant 0 : i32
    %c0_i32_0 = arith.constant 0 : i32
    %c0_i32_1 = arith.constant 0 : i32
    return %arg0, %c0_i32, %c0_i32_0 : i32, i32, i32
  }
  func.func @transform_5(%arg0: i32) -> (i32, i32) {
    %c0_i32 = arith.constant 0 : i32
    %c0_i32_0 = arith.constant 0 : i32
    %c0_i32_1 = arith.constant 0 : i32
    return %c0_i32, %c0_i32_0 : i32, i32
  }
  func.func @transform_6(%arg0: i32) -> (i32, i32) {
    %c0_i32 = arith.constant 0 : i32
    %c0_i32_0 = arith.constant 0 : i32
    %c0_i32_1 = arith.constant 0 : i32
    return %c0_i32, %c0_i32_0 : i32, i32
  }
  func.func @transform_7(%arg0: i32) -> (i32, i32) {
    %c0_i32 = arith.constant 0 : i32
    %c0_i32_0 = arith.constant 0 : i32
    %c0_i32_1 = arith.constant 0 : i32
    return %c0_i32, %c0_i32_0 : i32, i32
  }
}

</mosaic_0001>

<bundles_post_ra>
// kernel: forward.1
= control target key start
LH: loop header
LB: loop body
LE: loop exit
PB: predicated region body
PF: predicated region fallthrough
CT: control target
= control target key end

     0   :  { %s5189_s24 = smov 0   ;;  %s6098_s0 = inlined_call_operand.vmem [shape: f32[112,128], index: 0, kind: input, shape index: {}]   ;;  %s6099_s1 = inlined_call_operand.vmem [shape: f32[128,64], index: 1, kind: input, shape index: {}]   ;;  %s6100_s2 = inlined_call_operand.vmem [shape: f32[1,64], index: 2, kind: input, shape index: {}]   ;;  %s6101_s3 = inlined_call_operand.vmem [shape: f32[1,64], index: 3, kind: input, shape index: {}]   ;;  %s6102_s4 = inlined_call_operand.vmem [shape: f32[25,64,128], index: 4, kind: input, shape index: {}]   ;;  %s6103_s5 = inlined_call_operand.vmem [shape: f32[1,128], index: 5, kind: input, shape index: {}]   ;;  %s6104_s6 = inlined_call_operand.vmem [shape: f32[1,128], index: 6, kind: input, shape index: {}]   ;;  %s6105_s7 = inlined_call_operand.vmem [shape: f32[18,128], index: 7, kind: output, shape index: {}]  }
   0x1 LB: > { %s5195_s25 = sadd.s32 4294967295, %s5143_s24   ;;  %p3544_p0 = scmp.ge.s32.totalorder %s5143_s24, 1  ;;  %s5143_s24 = sphi %s5189_s24, %s17_s24  }
   0x2   : > { %p234_p1 = scmp.lt.s32.totalorder %s5143_s24, 6 }
   0x4   : > { %p235_p2 = pnand %p3544_p0, %p234_p1 }
   0x5   : > { %s262_s26 = smul.u32 (!%p235_p2), 5, %s5195_s25  ;;  %p3547_p4 = scmp.ne.s32.totalorder (!%p235_p2), %s5195_s25, 0 }
   0x6   : > { %238 = sbr.rel (%p235_p2) target bundleno = 924 (0x39c), region = 48 }
   0x7   : > { %p263_p3 = scmp.lt.s32.totalorder (!%p235_p2), %s262_s26, 24 }
   0xd   : > { %s6135_s26 = smov (!%p263_p3, %s262_s26), 24  ;;  %272 = sbr.rel (%p3547_p4) target bundleno = 389 (0x185), region = 52 }
   0xe   : > { %s3789_s27 = sshll.u32 %s6135_s26, 6  ;;  %v328_v0 = vld [vmem:[%s6099_s1] sm:$0xff] (!%p3547_p4)  ;;  %v329_v1 = vld [vmem:[%s6099_s1 + $0x8] sm:$0xff] (!%p3547_p4)  ;;  %v330_v2 = vld [vmem:[%s6099_s1 + $0x10] sm:$0xff] (!%p3547_p4)  ;;  %vm273_vm0 = vcmask (!%p3547_p4), 523264   ;;  %vm275_vm1 = vcmask (!%p3547_p4), 516096  }
   0xf   : > { %s5203_s30 = scalar_lea.vmem %s6102_s4, %s3789_s27  ;;  %v4713_v3 = vpack.c.bf16 (!%p3547_p4), %v329_v1, %v328_v0  ;;  %v331_v4 = vld [vmem:[%s6099_s1 + $0x18] sm:$0xff] (!%p3547_p4)  ;;  %v332_v6 = vld [vmem:[%s6099_s1 + $0x20] sm:$0xff] (!%p3547_p4)  ;;  %v333_v7 = vld [vmem:[%s6099_s1 + $0x28] sm:$0xff] (!%p3547_p4)  ;;  %v5145_v38 = vmov (!%p3547_p4), 0.0  }
  0x10   : > { %v4717_v5 = vpack.c.bf16 (!%p3547_p4), %v331_v4, %v330_v2  ;;  %v4721_v8 = vpack.c.bf16 (!%p3547_p4), %v333_v7, %v332_v6  ;;  %v314_v9 = vld [vmem:[%s6098_s0] sm:$0xff] (!%p3547_p4)  ;;  %v334_v10 = vld [vmem:[%s6099_s1 + $0x30] sm:$0xff] (!%p3547_p4)  ;;  %v335_v11 = vld [vmem:[%s6099_s1 + $0x38] sm:$0xff] (!%p3547_p4)  ;;  %274 = vst.msk [vmem:[#allocation2] sm:$0xff] (!%p3547_p4), %vm273_vm0, %v5145_v38 }
  0x11   : > { %4714 = vmatprep.subr.bf16.mxu0 (!%p3547_p4), %v4713_v3  ;;  %5105 = vmatprep.subr.bf16.mxu1 (!%p3547_p4), %v4713_v3  ;;  %v322_v12 = vld [vmem:[%s6098_s0 + $0x40] sm:$0xff] (!%p3547_p4)  ;;  %v4725_v13 = vpack.c.bf16 (!%p3547_p4), %v335_v11, %v334_v10  ;;  %v337_v15 = vld [vmem:[%s6099_s1 + $0x48] sm:$0xff] (!%p3547_p4)  ;;  %v338_v17 = vld [vmem:[%s6099_s1 + $0x50] sm:$0xff] (!%p3547_p4)  ;;  %276 = vst.msk [vmem:[#allocation2 + $0x8] sm:$0x1] (!%p3547_p4), %vm275_vm1, %v5145_v38 }
  0x12   : > { %4716 = vmatpush3.bf16.msra.mxu0 (!%p3547_p4), %v4713_v3  ;;  %5113 = vmatpush3.bf16.msra.mxu1 (!%p3547_p4), %v4713_v3  ;;  %v336_v14 = vld [vmem:[%s6099_s1 + $0x40] sm:$0xff] (!%p3547_p4)  ;;  %v339_v18 = vld [vmem:[%s6099_s1 + $0x58] sm:$0xff] (!%p3547_p4)  ;;  %v341_v21 = vld [vmem:[%s6099_s1 + $0x68] sm:$0xff] (!%p3547_p4)  ;;  %277 = vst.msk [vmem:[#allocation2 + $0x10] sm:$0xff] (!%p3547_p4), %vm273_vm0, %v5145_v38 }
  0x13   : > { %4718 = vmatprep.subr.bf16.mxu0 (!%p3547_p4), %v4717_v5  ;;  %5106 = vmatprep.subr.bf16.mxu1 (!%p3547_p4), %v4717_v5  ;;  %v4729_v16 = vpack.c.bf16 (!%p3547_p4), %v337_v15, %v336_v14  ;;  %v4733_v19 = vpack.c.bf16 (!%p3547_p4), %v339_v18, %v338_v17  ;;  %v340_v20 = vld [vmem:[%s6099_s1 + $0x60] sm:$0xff] (!%p3547_p4)  ;;  %v342_v23 = vld [vmem:[%s6099_s1 + $0x70] sm:$0xff] (!%p3547_p4)  ;;  %v343_v24 = vld [vmem:[%s6099_s1 + $0x78] sm:$0xff] (!%p3547_p4)  ;;  %278 = vst.msk [vmem:[#allocation2 + $0x18] sm:$0x1] (!%p3547_p4), %vm275_vm1, %v5145_v38  ;;  %v513_v15 = vlaneseq (!%p3547_p4) }
  0x14   : > { %4122 = vmatprep.mubr.f32.mxu0 %v314_v9  ;;  %4134 = vmatprep.mubr.f32.mxu1 %v322_v12  ;;  %v4737_v22 = vpack.c.bf16 %v341_v21, %v340_v20  ;;  %v4741_v25 = vpack.c.bf16 %v343_v24, %v342_v23  ;;  %v315_v26 = vld [vmem:[%s6098_s0 + $0x8] sm:$0xff]  ;;  %v316_v28 = vld [vmem:[%s6098_s0 + $0x10] sm:$0xff]  ;;  %v317_v30 = vld [vmem:[%s6098_s0 + $0x18] sm:$0xff]  ;;  %279 = vst.msk [vmem:[#allocation2 + $0x20] sm:$0xff] %vm273_vm0, %v5145_v38 }
  0x15   : > { %v323_v27 = vld [vmem:[%s6098_s0 + $0x48] sm:$0xff]  ;;  %v324_v29 = vld [vmem:[%s6098_s0 + $0x50] sm:$0xff]  ;;  %v325_v31 = vld [vmem:[%s6098_s0 + $0x58] sm:$0xff]  ;;  %280 = vst.msk [vmem:[#allocation2 + $0x28] sm:$0x1] %vm275_vm1, %v5145_v38  ;;  %v5388_v18 = vshrl.u32 %v513_v15, 7 }
  0x16   : > { %4720 = vmatpush3.bf16.msra.mxu0 %v4717_v5  ;;  %5114 = vmatpush3.bf16.msra.mxu1 %v4717_v5  ;;  %v318_v32 = vld [vmem:[%s6098_s0 + $0x20] sm:$0xff]  ;;  %v319_v34 = vld [vmem:[%s6098_s0 + $0x28] sm:$0xff]  ;;  %v320_v36 = vld [vmem:[%s6098_s0 + $0x30] sm:$0xff]  ;;  %281 = vst.msk [vmem:[#allocation2 + $0x30] sm:$0xff] %vm273_vm0, %v5145_v38 }
  0x17   : > { %4722 = vmatprep.subr.bf16.mxu0 %v4721_v8  ;;  %5107 = vmatprep.subr.bf16.mxu1 %v4721_v8  ;;  %v326_v33 = vld [vmem:[%s6098_s0 + $0x60] sm:$0xff]  ;;  %v327_v35 = vld [vmem:[%s6098_s0 + $0x68] sm:$0xff]  ;;  %v321_v37 = vld [vmem:[%s6098_s0 + $0x38] sm:$0xff]  ;;  %282 = vst.msk [vmem:[#allocation2 + $0x38] sm:$0x1] %vm275_vm1, %v5145_v38  ;;  %v515_v21 = vadd.s32 8, %v5388_v18 }
  0x18   : > { %283 = vst.msk [vmem:[#allocation2 + $0x40] sm:$0xff] %vm273_vm0, %v5145_v38  ;;  %285 = vst.msk [vmem:[#allocation2 + $0x50] sm:$0xff] %vm273_vm0, %v5145_v38  ;;  %v523_v15 = vadd.s32 72, %v5388_v18 }
  0x19   : > { %284 = vst.msk [vmem:[#allocation2 + $0x48] sm:$0x1] %vm275_vm1, %v5145_v38  ;;  %286 = vst.msk [vmem:[#allocation2 + $0x58] sm:$0x1] %vm275_vm1, %v5145_v38 }
  0x1a   : > { %4724 = vmatpush3.bf16.msra.mxu0 %v4721_v8  ;;  %5115 = vmatpush3.bf16.msra.mxu1 %v4721_v8  ;;  %287 = vst.msk [vmem:[#allocation2 + $0x60] sm:$0xff] %vm273_vm0, %v5145_v38  ;;  %289 = vst.msk [vmem:[#allocation2 + $0x70] sm:$0xff] %vm273_vm0, %v5145_v38 }
  0x1b   : > { %4726 = vmatprep.subr.bf16.mxu0 %v4725_v13  ;;  %5108 = vmatprep.subr.bf16.mxu1 %v4725_v13  ;;  %288 = vst.msk [vmem:[#allocation2 + $0x68] sm:$0x1] %vm275_vm1, %v5145_v38  ;;  %290 = vst.msk [vmem:[#allocation2 + $0x78] sm:$0x1] %vm275_vm1, %v5145_v38 }
  0x1c   : > { %291 = vst.msk [vmem:[#allocation2 + $0x80] sm:$0xff] %vm273_vm0, %v5145_v38  ;;  %293 = vst.msk [vmem:[#allocation2 + $0x90] sm:$0xff] %vm273_vm0, %v5145_v38 }
  0x1d   : > { %292 = vst.msk [vmem:[#allocation2 + $0x88] sm:$0x1] %vm275_vm1, %v5145_v38  ;;  %294 = vst.msk [vmem:[#allocation2 + $0x98] sm:$0x1] %vm275_vm1, %v5145_v38 }
  0x1e   : > { %4728 = vmatpush3.bf16.msra.mxu0 %v4725_v13  ;;  %5116 = vmatpush3.bf16.msra.mxu1 %v4725_v13  ;;  %295 = vst.msk [vmem:[#allocation2 + $0xa0] sm:$0xff] %vm273_vm0, %v5145_v38  ;;  %297 = vst.msk [vmem:[#allocation2 + $0xb0] sm:$0xff] %vm273_vm0, %v5145_v38 }
  0x1f   : > { %4730 = vmatprep.subr.bf16.mxu0 %v4729_v16  ;;  %5109 = vmatprep.subr.bf16.mxu1 %v4729_v16  ;;  %296 = vst.msk [vmem:[#allocation2 + $0xa8] sm:$0x1] %vm275_vm1, %v5145_v38  ;;  %298 = vst.msk [vmem:[#allocation2 + $0xb8] sm:$0x1] %vm275_vm1, %v5145_v38 }
  0x20   : > { %299 = vst.msk [vmem:[#allocation2 + $0xc0] sm:$0xff] %vm273_vm0, %v5145_v38  ;;  %301 = vst.msk [vmem:[#allocation2 + $0xd0] sm:$0xff] %vm273_vm0, %v5145_v38 }
  0x21   : > { %300 = vst.msk [vmem:[#allocation2 + $0xc8] sm:$0x1] %vm275_vm1, %v5145_v38  ;;  %302 = vst.msk [vmem:[#allocation2 + $0xd8] sm:$0x1] %vm275_vm1, %v5145_v38 }
  0x22   : > { %4732 = vmatpush3.bf16.msra.mxu0 %v4729_v16  ;;  %5117 = vmatpush3.bf16.msra.mxu1 %v4729_v16  ;;  %303 = vst.msk [vmem:[#allocation2 + $0xe0] sm:$0xff] %vm273_vm0, %v5145_v38  ;;  %305 = vst.msk [vmem:[#allocation2 + $0xf0] sm:$0xff] %vm273_vm0, %v5145_v38 }
  0x23   : > { %4734 = vmatprep.subr.bf16.mxu0 %v4733_v19  ;;  %5110 = vmatprep.subr.bf16.mxu1 %v4733_v19  ;;  %304 = vst.msk [vmem:[#allocation2 + $0xe8] sm:$0x1] %vm275_vm1, %v5145_v38  ;;  %306 = vst.msk [vmem:[#allocation2 + $0xf8] sm:$0x1] %vm275_vm1, %v5145_v38 }
  0x24   : > { %307 = vst.msk [vmem:[#allocation2 + $0x100] sm:$0xff] %vm273_vm0, %v5145_v38  ;;  %309 = vst.msk [vmem:[#allocation2 + $0x110] sm:$0xff] %vm273_vm0, %v5145_v38 }
  0x25   : > { %308 = vst.msk [vmem:[#allocation2 + $0x108] sm:$0x1] %vm275_vm1, %v5145_v38  ;;  %310 = vst.msk [vmem:[#allocation2 + $0x118] sm:$0x1] %vm275_vm1, %v5145_v38 }
  0x26   : > { %4736 = vmatpush3.bf16.msra.mxu0 %v4733_v19  ;;  %5118 = vmatpush3.bf16.msra.mxu1 %v4733_v19  ;;  %311 = vst [vmem:[#allocation3] sm:$0xff] %v5145_v38  ;;  %312 = vst [vmem:[#allocation3 + $0x8] sm:$0xff] %v5145_v38 }
  0x27   : > { %4738 = vmatprep.subr.bf16.mxu0 %v4737_v22  ;;  %5111 = vmatprep.subr.bf16.mxu1 %v4737_v22  ;;  %313 = vst [vmem:[#allocation3 + $0x10] sm:$0x3] %v5145_v38 }
  0x2a   : > { %4740 = vmatpush3.bf16.msra.mxu0 %v4737_v22  ;;  %5119 = vmatpush3.bf16.msra.mxu1 %v4737_v22  ;;  %v516_v22 = vadd.s32 16, %v5388_v18 }
  0x2b   : > { %4742 = vmatprep.subr.bf16.mxu0 %v4741_v25  ;;  %5112 = vmatprep.subr.bf16.mxu1 %v4741_v25 }
  0x2e   : > { %4744 = vmatpush3.bf16.msra.mxu0 %v4741_v25  ;;  %5120 = vmatpush3.bf16.msra.mxu1 %v4741_v25  ;;  %v517_v25 = vadd.s32 24, %v5388_v18 }
  0x31   : > { %4123 = vmatmul.mubr.f32.vlgmr.msra.gmra.mrb[0].mxu0 %v315_v26  ;;  %4135 = vmatmul.mubr.f32.vlgmr.msra.gmra.mrb[0].mxu1 %v323_v27  ;;  %v518_v26 = vadd.s32 32, %v5388_v18  ;;  %v532_v27 = vand.u32 7, %v5388_v18 }
  0x32   : > { %4125 = vmatprep.mubr.f32.mxu0 %v316_v28  ;;  %4137 = vmatprep.mubr.f32.mxu1 %v324_v29  ;;  %v539_v28 = vand.u32 7, %v515_v21  ;;  %v546_v29 = vand.u32 7, %v516_v22 }
  0x33   : > { %vm5399_vm2 = vcmp.ne.s32.totalorder %v532_v27, 3  ;;  %v525_v27 = vadd.s32 88, %v5388_v18 }
  0x34   : > { %vm5403_vm3 = vcmp.ne.s32.totalorder %v539_v28, 3  ;;  %vm5407_vm4 = vcmp.ne.s32.totalorder %v546_v29, 3 }
  0x35   : > { %4126 = vmatmul.mubr.f32.gmra.mrb[2].mxu0 %v317_v30  ;;  %4138 = vmatmul.mubr.f32.gmra.mrb[2].mxu1 %v325_v31 }
  0x36   : > { %4128 = vmatprep.mubr.f32.mxu0 %v318_v32  ;;  %4140 = vmatprep.mubr.f32.mxu1 %v326_v33  ;;  %v519_v32 = vadd.s32 40, %v5388_v18  ;;  %v520_v33 = vadd.s32 48, %v5388_v18 }
  0x39   : > { %4129 = vmatmul.mubr.f32.gmra.mrb[4].mxu0 %v319_v34  ;;  %4141 = vmatmul.mubr.f32.gmra.mrb[4].mxu1 %v327_v35  ;;  %v553_v34 = vand.u32 7, %v517_v25  ;;  %v560_v35 = vand.u32 7, %v518_v26 }
  0x3a   : > { %4131 = vmatprep.mubr.f32.mxu0 %v320_v36 }
  0x3b   : > { %vm5440_vm5 = vcmp.ne.s32.totalorder %v553_v34, 3  ;;  %vm5451_vm6 = vcmp.ne.s32.totalorder %v560_v35, 3  ;;  %v526_v35 = vadd.s32 96, %v5388_v18 }
  0x3d   : > { %4132 = vmatmul.mubr.f32.gmra.mrb[6].mxu0 %v321_v37 }
 0x104   : > { %v5332_v39 = vpop.f32.mrb[0].mxu0  ;;  %v5334_v40 = vpop.f32.mrb[0].mxu1 }
 0x105   : > { %v480_v41 = vsel %vm273_vm0, %v5332_v39, 0.0  ;;  %v5338_v42 = vpop.f32.mrb[1].mxu0  ;;  %v5340_v43 = vpop.f32.mrb[1].mxu1  ;;  %v496_v6 = vsel %vm273_vm0, %v5334_v40, 0.0 }
 0x106   : > { %v479_v44 = vsel %vm273_vm0, %v5338_v42, 0.0  ;;  %v494_v3 = vsel %vm273_vm0, %v5340_v43, 0.0 }
 0x107   : > { %v481_v45 = vadd.f32 %v480_v41, %v479_v44 }
 0x108   : > { %v5344_v46 = vpop.f32.mrb[2].mxu0  ;;  %v5346_v47 = vpop.f32.mrb[2].mxu1 }
 0x109   : > { %v5348_v48 = vpop.f32.mrb[3].mxu0  ;;  %v5350_v49 = vpop.f32.mrb[3].mxu1  ;;  %v484_v52 = vsel %vm273_vm0, %v5344_v46, 0.0  ;;  %v500_v10 = vsel %vm273_vm0, %v5346_v47, 0.0 }
 0x10a   : > { %v482_v50 = vsel %vm273_vm0, %v5348_v48, 0.0  ;;  %v498_v7 = vsel %vm273_vm0, %v5350_v49, 0.0 }
 0x10b   : > { %v483_v51 = vadd.f32 %v482_v50, %v481_v45 }
 0x10c   : > { %v5356_v53 = vpop.f32.mrb[4].mxu0  ;;  %v5358_v54 = vpop.f32.mrb[4].mxu1 }
 0x10d   : > { %v5360_v55 = vpop.f32.mrb[5].mxu0  ;;  %v485_v56 = vadd.f32 %v484_v52, %v483_v51  ;;  %v5362_v57 = vpop.f32.mrb[5].mxu1  ;;  %v488_v60 = vsel %vm273_vm0, %v5356_v53, 0.0  ;;  %v504_v14 = vsel %vm273_vm0, %v5358_v54, 0.0 }
 0x10e   : > { %v486_v58 = vsel %vm273_vm0, %v5360_v55, 0.0  ;;  %v502_v11 = vsel %vm273_vm0, %v5362_v57, 0.0 }
 0x10f   : > { %v487_v59 = vadd.f32 %v486_v58, %v485_v56 }
 0x110   : > { %v5368_v61 = vpop.f32.mrb[6].mxu0 }
 0x111   : > { %v5370_v62 = vpop.f32.mrb[7].mxu0  ;;  %v489_v63 = vadd.f32 %v488_v60, %v487_v59  ;;  %v492_v2 = vsel %vm273_vm0, %v5368_v61, 0.0 }
 0x112   : > { %v490_v0 = vsel %vm273_vm0, %v5370_v62, 0.0 }
 0x113   : > { %v491_v1 = vadd.f32 %v490_v0, %v489_v63 }
 0x115   : > { %v493_v4 = vadd.f32 %v492_v2, %v491_v1  ;;  %v521_v1 = vadd.s32 56, %v5388_v18 }
 0x117   : > { %v495_v5 = vadd.f32 %v494_v3, %v493_v4  ;;  %v567_v4 = vand.u32 7, %v519_v32 }
 0x119   : > { %v497_v8 = vadd.f32 %v496_v6, %v495_v5  ;;  %vm5458_vm7 = vcmp.ne.s32.totalorder %v567_v4, 3 }
 0x11b   : > { %v499_v9 = vadd.f32 %v498_v7, %v497_v8  ;;  %v522_v8 = vadd.s32 64, %v5388_v18 }
 0x11d   : > { %v501_v12 = vadd.f32 %v500_v10, %v499_v9  ;;  %v574_v10 = vand.u32 7, %v520_v33  ;;  %v588_v21 = vand.u32 7, %v522_v8 }
 0x11f   : > { %v503_v13 = vadd.f32 %v502_v11, %v501_v12  ;;  %vm5465_vm8 = vcmp.ne.s32.totalorder %v574_v10, 3  ;;  %vm5482_vm10 = vcmp.ne.s32.totalorder %v588_v21, 3 }
 0x121   : > { %v505_v16 = vadd.f32 %v504_v14, %v503_v13 }
 0x123   : > { %v506_v17 = vrot.slane %v505_v16, 4 }
 0x125   : > { %v507_v19 = vadd.f32 %v506_v17, %v505_v16  ;;  %v581_v16 = vand.u32 7, %v521_v1  ;;  %v527_v1 = vadd.s32 104, %v5388_v18 }
 0x127   : > { %v508_v20 = vrot.slane %v507_v19, 2  ;;  %vm5474_vm9 = vcmp.ne.s32.totalorder %v581_v16, 3 }
 0x129   : > { %v509_v23 = vadd.f32 %v508_v20, %v507_v19  ;;  %v524_v20 = vadd.s32 80, %v5388_v18 }
 0x12b   : > { %v510_v24 = vrot.slane %v509_v23, 1 }
 0x12d   : > { %v511_v30 = vadd.f32 %v510_v24, %v509_v23 }
 0x12f   : > { %v5395_v31 = vmul.f32 0.010204081, %v511_v30  ;;  %v595_v30 = vand.u32 7, %v523_v15 }
 0x131   : > { %v710_v41 = vsub.f32 %v5338_v42, %v5395_v31  ;;  %v711_v44 = vsub.f32 %v5332_v39, %v5395_v31  ;;  %v712_v45 = vsub.f32 %v5348_v48, %v5395_v31  ;;  %v713_v50 = vsub.f32 %v5344_v46, %v5395_v31 }
 0x132   : > { %v714_v51 = vsub.f32 %v5360_v55, %v5395_v31  ;;  %v715_v52 = vsub.f32 %v5356_v53, %v5395_v31  ;;  %v716_v56 = vsub.f32 %v5370_v62, %v5395_v31  ;;  %v717_v58 = vsub.f32 %v5368_v61, %v5395_v31 }
 0x133   : > { %v718_v59 = vsub.f32 %v5340_v43, %v5395_v31  ;;  %v719_v60 = vsub.f32 %v5334_v40, %v5395_v31  ;;  %v720_v63 = vsub.f32 %v5350_v49, %v5395_v31  ;;  %v721_v0 = vsub.f32 %v5346_v47, %v5395_v31 }
 0x134   : > { %v722_v2 = vsub.f32 %v5362_v57, %v5395_v31  ;;  %v723_v3 = vsub.f32 %v5358_v54, %v5395_v31  ;;  %v752_v6 = vsel %vm5399_vm2, %v710_v41, 0.0  ;;  %v753_v7 = vsel %vm5403_vm3, %v711_v44, 0.0 }
 0x135   : > { %v754_v9 = vsel %vm5407_vm4, %v712_v45, 0.0  ;;  %v755_v12 = vsel %vm5440_vm5, %v713_v50, 0.0  ;;  %v766_v13 = vmul.f32 %v752_v6, %v752_v6  ;;  %v767_v14 = vmul.f32 %v753_v7, %v753_v7 }
 0x136   : > { %v768_v19 = vmul.f32 %v754_v9, %v754_v9  ;;  %v756_v22 = vsel %vm5451_vm6, %v714_v51, 0.0  ;;  %v769_v24 = vmul.f32 %v755_v12, %v755_v12  ;;  %v757_v28 = vsel %vm5458_vm7, %v715_v52, 0.0 }
 0x137   : > { %v780_v25 = vsel %vm273_vm0, %v766_v13, 0.0  ;;  %v781_v26 = vsel %vm273_vm0, %v767_v14, 0.0  ;;  %v770_v33 = vmul.f32 %v756_v22, %v756_v22  ;;  %v758_v41 = vsel %vm5465_vm8, %v716_v56, 0.0 }
 0x138   : > { %v782_v29 = vadd.f32 %v781_v26, %v780_v25  ;;  %v783_v34 = vsel %vm273_vm0, %v768_v19, 0.0  ;;  %v602_v45 = vand.u32 7, %v524_v20  ;;  %v771_v51 = vmul.f32 %v757_v28, %v757_v28 }
 0x139   : > { %v785_v52 = vsel %vm273_vm0, %v769_v24, 0.0  ;;  %v759_v4 = vsel %vm5474_vm9, %v717_v58, 0.0  ;;  %v609_v7 = vand.u32 7, %v525_v27  ;;  %vm5490_vm11 = vcmp.ne.s32.totalorder %v595_v30, 3 }
 0x13a   : > { %v784_v44 = vadd.f32 %v783_v34, %v782_v29  ;;  %v772_v56 = vmul.f32 %v758_v41, %v758_v41  ;;  %v787_v9 = vsel %vm273_vm0, %v770_v33, 0.0  ;;  %v760_v10 = vsel %vm5482_vm10, %v718_v59, 0.0 }
 0x13b   : > { %v616_v13 = vand.u32 7, %v526_v35  ;;  %vm5497_vm12 = vcmp.ne.s32.totalorder %v602_v45, 3  ;;  %v773_v15 = vmul.f32 %v759_v4, %v759_v4  ;;  %v789_v58 = vsel %vm273_vm0, %v771_v51, 0.0 }
 0x13c   : > { %v786_v6 = vadd.f32 %v785_v52, %v784_v44  ;;  %v761_v16 = vsel %vm5490_vm11, %v719_v60, 0.0  ;;  %v623_v20 = vand.u32 7, %v527_v1  ;;  %vm5504_vm13 = vcmp.ne.s32.totalorder %v609_v7, 3 }
 0x13d   : > { %v774_v22 = vmul.f32 %v760_v10, %v760_v10  ;;  %v791_v59 = vsel %vm273_vm0, %v772_v56, 0.0  ;;  %v762_v24 = vsel %vm5497_vm12, %v720_v63, 0.0  ;;  %vm5511_vm14 = vcmp.ne.s32.totalorder %v616_v13, 3 }
 0x13e   : > { %v788_v12 = vadd.f32 %v787_v9, %v786_v6  ;;  %v775_v27 = vmul.f32 %v761_v16, %v761_v16  ;;  %v793_v60 = vsel %vm273_vm0, %v773_v15, 0.0  ;;  %v763_v28 = vsel %vm5504_vm13, %v721_v0, 0.0 }
 0x13f   : > { %vm5521_vm15 = vcmp.ne.s32.totalorder %v623_v20, 3  ;;  %v776_v63 = vmul.f32 %v762_v24, %v762_v24  ;;  %v795_v33 = vsel %vm273_vm0, %v774_v22, 0.0  ;;  %v764_v34 = vsel %vm5511_vm14, %v722_v2, 0.0  ;;  %v816_v22 = vld [vmem:[%s6100_s2] sm:$0x1] }
 0x140   : > { %v790_v19 = vadd.f32 %v789_v58, %v788_v12  ;;  %v777_v41 = vmul.f32 %v763_v28, %v763_v28  ;;  %v797_v44 = vsel %vm273_vm0, %v775_v27, 0.0  ;;  %v765_v0 = vsel %vm5521_vm15, %v723_v3, 0.0  ;;  %v818_v27 = vld [vmem:[%s6101_s3] sm:$0x1] }
 0x141   : > { %v778_v51 = vmul.f32 %v764_v34, %v764_v34  ;;  %v799_v52 = vsel %vm273_vm0, %v776_v63, 0.0  ;;  %v779_v4 = vmul.f32 %v765_v0, %v765_v0 }
 0x142   : > { %v792_v25 = vadd.f32 %v791_v59, %v790_v19  ;;  %v801_v6 = vsel %vm273_vm0, %v777_v41, 0.0  ;;  %v823_v59 = vsub.s32 0, %v5388_v18 }
 0x143   : > { %v803_v2 = vsel %vm273_vm0, %v778_v51, 0.0  ;;  %v805_v9 = vsel %vm273_vm0, %v779_v4, 0.0 }
 0x144   : > { %v794_v29 = vadd.f32 %v793_v60, %v792_v25 }
 0x146   : > { %v796_v35 = vadd.f32 %v795_v33, %v794_v29 }
 0x148   : > { %v798_v45 = vadd.f32 %v797_v44, %v796_v35 }
 0x14a   : > { %v800_v1 = vadd.f32 %v799_v52, %v798_v45 }
 0x14c   : > { %v802_v7 = vadd.f32 %v801_v6, %v800_v1 }
 0x14e   : > { %v804_v56 = vadd.f32 %v803_v2, %v802_v7 }
 0x150   : > { %v806_v10 = vadd.f32 %v805_v9, %v804_v56 }
 0x152   : > { %v807_v12 = vrot.slane %v806_v10, 4 }
 0x154   : > { %v808_v13 = vadd.f32 %v807_v12, %v806_v10 }
 0x156   : > { %v809_v15 = vrot.slane %v808_v13, 2 }
 0x158   : > { %v810_v58 = vadd.f32 %v809_v15, %v808_v13 }
 0x15a   : > { %v811_v3 = vrot.slane %v810_v58, 1 }
 0x15c   : > { %v812_v16 = vadd.f32 %v811_v3, %v810_v58 }
 0x15e   : > { %v813_v19 = vmul.f32 0.010204081, %v812_v16 }
 0x160   : > { %v814_v20 = vadd.f32 1e-05, %v813_v19 }
 0x162   : > { %5133 = vrsqrt.f32 %v814_v20 }
 0x16c   : > { %v5134_v24 = vpop.eup %5133 }
 0x16d   : > { %v817_v25 = vmul.f32 %v5134_v24, %v816_v22 }
 0x16f   : > { %v819_v60 = vmul.f32 %v817_v25, %v5395_v31  ;;  %v824_v28 = vrot.slane %v817_v25, %v823_v59 }
 0x171   : > { %v820_v29 = vsub.f32 %v818_v27, %v819_v60  ;;  %v825_v63 = vmul.f32 %v824_v28, %v5338_v42  ;;  %v826_v33 = vmul.f32 %v5332_v39, %v824_v28  ;;  %v827_v34 = vmul.f32 %v824_v28, %v5348_v48 }
 0x172   : > { %v828_v35 = vmul.f32 %v5344_v46, %v824_v28  ;;  %v829_v18 = vmul.f32 %v824_v28, %v5360_v55  ;;  %v830_v41 = vmul.f32 %v5356_v53, %v824_v28  ;;  %v831_v44 = vmul.f32 %v824_v28, %v5370_v62 }
 0x173   : > { %v832_v0 = vmul.f32 %v5368_v61, %v824_v28  ;;  %v833_v31 = vmul.f32 %v824_v28, %v5340_v43  ;;  %v834_v45 = vmul.f32 %v5334_v40, %v824_v28  ;;  %v835_v42 = vmul.f32 %v824_v28, %v5350_v49 }
 0x174   : > { %v836_v39 = vmul.f32 %v5346_v47, %v824_v28  ;;  %v837_v48 = vmul.f32 %v824_v28, %v5362_v57  ;;  %v838_v46 = vmul.f32 %v5358_v54, %v824_v28  ;;  %v843_v51 = vrot.slane %v820_v29, %v823_v59 }
 0x176   : > { %v845_v55 = vadd.f32 %v843_v51, %v825_v63  ;;  %v846_v52 = vadd.f32 %v843_v51, %v826_v33  ;;  %v847_v53 = vadd.f32 %v843_v51, %v827_v34  ;;  %v848_v1 = vadd.f32 %v843_v51, %v828_v35 }
 0x177   : > { %v849_v62 = vadd.f32 %v843_v51, %v829_v18  ;;  %v850_v4 = vadd.f32 %v843_v51, %v830_v41  ;;  %v851_v61 = vadd.f32 %v843_v51, %v831_v44  ;;  %v852_v6 = vadd.f32 %v843_v51, %v832_v0 }
 0x178   : > { %v853_v43 = vadd.f32 %v843_v51, %v833_v31  ;;  %v854_v7 = vadd.f32 %v843_v51, %v834_v45  ;;  %v855_v40 = vadd.f32 %v843_v51, %v835_v42  ;;  %v856_v2 = vadd.f32 %v843_v51, %v836_v39 }
 0x179   : > { %v857_v49 = vadd.f32 %v843_v51, %v837_v48  ;;  %v858_v56 = vadd.f32 %v843_v51, %v838_v46  ;;  %v859_v47 = vmax.f32 %v845_v55, 0.0  ;;  %v860_v9 = vmax.f32 %v846_v52, 0.0 }
 0x17a   : > { %v861_v57 = vmax.f32 %v847_v53, 0.0  ;;  %v862_v10 = vmax.f32 %v848_v1, 0.0  ;;  %v863_v54 = vmax.f32 %v849_v62, 0.0  ;;  %v864_v12 = vmax.f32 %v850_v4, 0.0 }
 0x17b   : > { %v865_v13 = vmax.f32 %v851_v61, 0.0  ;;  %v866_v15 = vmax.f32 %v852_v6, 0.0  ;;  %v867_v58 = vmax.f32 %v853_v43, 0.0  ;;  %v868_v3 = vmax.f32 %v854_v7, 0.0 }
 0x17c   : > { %v869_v16 = vmax.f32 %v855_v40, 0.0  ;;  %v870_v19 = vmax.f32 %v856_v2, 0.0  ;;  %v871_v20 = vmax.f32 %v857_v49, 0.0  ;;  %v872_v22 = vmax.f32 %v858_v56, 0.0 }
 0x17d   : > { %v873_v59 = vsel %vm5399_vm2, %v859_v47, 0.0  ;;  %v874_v24 = vsel %vm5403_vm3, %v860_v9, 0.0  ;;  %v875_v25 = vsel %vm5407_vm4, %v861_v57, 0.0  ;;  %v876_v27 = vsel %vm5440_vm5, %v862_v10, 0.0 }
 0x17e   : > { %v877_v60 = vsel %vm5451_vm6, %v863_v54, 0.0  ;;  %v878_v28 = vsel %vm5458_vm7, %v864_v12, 0.0  ;;  %v879_v29 = vsel %vm5465_vm8, %v865_v13, 0.0  ;;  %v880_v36 = vsel %vm5474_vm9, %v866_v15, 0.0  ;;  %888 = vst.msk [vmem:[#allocation2 + $0x11] sm:$0xff] %vm273_vm0, %v873_v59  ;;  %890 = vst.msk [vmem:[#allocation2 + $0x21] sm:$0xff] %vm273_vm0, %v874_v24 }
 0x17f   : > { %892 = vst.msk [vmem:[#allocation2 + $0x31] sm:$0xff] %vm273_vm0, %v875_v25  ;;  %894 = vst.msk [vmem:[#allocation2 + $0x41] sm:$0xff] %vm273_vm0, %v876_v27  ;;  %v881_v37 = vsel %vm5482_vm10, %v867_v58, 0.0  ;;  %v882_v38 = vsel %vm5490_vm11, %v868_v3, 0.0  ;;  %v883_v5 = vsel %vm5497_vm12, %v869_v16, 0.0  ;;  %v884_v11 = vsel %vm5504_vm13, %v870_v19, 0.0 }
 0x180   : > { %896 = vst.msk [vmem:[#allocation2 + $0x51] sm:$0xff] %vm273_vm0, %v877_v60  ;;  %898 = vst.msk [vmem:[#allocation2 + $0x61] sm:$0xff] %vm273_vm0, %v878_v28  ;;  %v885_v17 = vsel %vm5511_vm14, %v871_v20, 0.0  ;;  %v886_v23 = vsel %vm5521_vm15, %v872_v22, 0.0 }
 0x181   : > { %900 = vst.msk [vmem:[#allocation2 + $0x71] sm:$0xff] %vm273_vm0, %v879_v29  ;;  %902 = vst.msk [vmem:[#allocation2 + $0xa1] sm:$0xff] %vm273_vm0, %v880_v36 }
 0x182   : > { %904 = vst.msk [vmem:[#allocation2 + $0xb1] sm:$0xff] %vm273_vm0, %v881_v37  ;;  %906 = vst.msk [vmem:[#allocation2 + $0xc1] sm:$0xff] %vm273_vm0, %v882_v38 }
 0x183   : > { %908 = vst.msk [vmem:[#allocation2 + $0xd1] sm:$0xff] %vm273_vm0, %v883_v5  ;;  %910 = vst.msk [vmem:[#allocation2 + $0xe1] sm:$0xff] %vm273_vm0, %v884_v11 }
 0x184   : > { %912 = vst.msk [vmem:[#allocation2 + $0xf1] sm:$0xff] %vm273_vm0, %v885_v17  ;;  %914 = vst.msk [vmem:[#allocation2 + $0x101] sm:$0xff] %vm273_vm0, %v886_v23 }
 0x185 PF: > { %v3549_v32 = vld [vmem:[%s5203_s30 + $0x40] sm:$0xff]  ;;  %v3550_v50 = vld [vmem:[%s5203_s30 + $0x48] sm:$0xff]  ;;  %v5146_v14 = vmov 0.0|0.0   ;;  %v3551_v30 = vld [vmem:[%s5203_s30 + $0x50] sm:$0xff]  ;;  %vm5147_vm0 = vmmov 0   ;;  %v5148_v18 = vmov 0.0  }
 0x186   : > { %v919_v8 = vld [vmem:[%s5203_s30] sm:$0xff]  ;;  %4745 = vmatprep.subr.bf16.mxu0 %v5146_v14  ;;  %v5609_v21 = vpack.c.bf16 %v3550_v50, %v3549_v32  ;;  %4757 = vmatprep.subr.bf16.mxu1 %v5146_v14  ;;  %v920_v26 = vld [vmem:[%s5203_s30 + $0x8] sm:$0xff]  ;;  %v3552_v63 = vld [vmem:[%s5203_s30 + $0x58] sm:$0xff]  ;;  %s3548_s12 = sshll.u32 %s5195_s25, 4  ;;  %vm938_vm1 = vcmask 523264   ;;  %vm1176_vm2 = vcmask 1041408  }
 0x187   : > { %v5615_v33 = vpack.c.bf16 %v920_v26, %v919_v8  ;;  %v921_v34 = vld [vmem:[%s5203_s30 + $0x10] sm:$0xff]  ;;  %v922_v35 = vld [vmem:[%s5203_s30 + $0x18] sm:$0xff]  ;;  %4159 = vmatprep.mubr.msk.f32.mxu0 %vm5147_vm0, %v5148_v18  ;;  %4178 = vmatprep.mubr.msk.f32.mxu1 %vm5147_vm0, %v5148_v18  ;;  %v5624_v41 = vpack.c.bf16 %v3552_v63, %v3551_v30  ;;  %v3553_v0 = vld [vmem:[%s5203_s30 + $0x60] sm:$0xff]  ;;  %s5651_s13 = scalar_lea.vmem [#allocation2], %s3548_s12  ;;  %p3786_p5 = scmp.ne.s32.totalorder %s5195_s25, 4 }
 0x188   : > { %4747 = vmatpush3.bf16.msra.mxu0 %v5609_v21  ;;  %v5628_v44 = vpack.c.bf16 %v922_v35, %v921_v34  ;;  %v3554_v31 = vld [vmem:[%s5203_s30 + $0x68] sm:$0xff]  ;;  %v923_v45 = vld [vmem:[%s5203_s30 + $0x20] sm:$0xff]  ;;  %v3555_v46 = vld [vmem:[%s5203_s30 + $0x70] sm:$0xff] }
 0x189   : > { %4759 = vmatpush3.bf16.msra.mxu1 %v5615_v33  ;;  %4748 = vmatprep.subr.bf16.mxu0 %v5146_v14  ;;  %v924_v42 = vld [vmem:[%s5203_s30 + $0x28] sm:$0xff]  ;;  %v5637_v39 = vpack.c.bf16 %v3554_v31, %v3553_v0  ;;  %v3556_v51 = vld [vmem:[%s5203_s30 + $0x78] sm:$0xff]  ;;  %v925_v55 = vld [vmem:[%s5203_s30 + $0x30] sm:$0xff] }
 0x18a   : > { %4760 = vmatprep.subr.bf16.mxu1 %v5146_v14  ;;  %v5641_v48 = vpack.c.bf16 %v924_v42, %v923_v45  ;;  %v926_v52 = vld [vmem:[%s5203_s30 + $0x38] sm:$0xff]  ;;  %v5649_v53 = vpack.c.bf16 %v3556_v51, %v3555_v46  ;;  %v3559_v4 = vld [vmem:[%s5203_s30 + $0x80] sm:$0xff]  ;;  %v3560_v61 = vld [vmem:[%s5203_s30 + $0x88] sm:$0xff] }
 0x18b   : > { %v5654_v1 = vld [vmem:[%s5651_s13] sm:$0xff]  ;;  %v5658_v62 = vpack.c.bf16 %v926_v52, %v925_v55  ;;  %v3569_v43 = vld [vmem:[%s5203_s30 + $0xc8] sm:$0xff]  ;;  %v5667_v40 = vpack.c.bf16 %v3560_v61, %v3559_v4  ;;  %v3561_v49 = vld [vmem:[%s5203_s30 + $0x90] sm:$0xff] }
 0x18c   : > { %4750 = vmatpush3.bf16.msra.mxu0 %v5624_v41  ;;  %v3568_v6 = vld [vmem:[%s5203_s30 + $0xc0] sm:$0xff]  ;;  %v937_v7 = vrot.slane %v5654_v1, 5  ;;  %v3562_v56 = vld [vmem:[%s5203_s30 + $0x98] sm:$0xff]  ;;  %v3570_v47 = vld [vmem:[%s5203_s30 + $0xd0] sm:$0xff]  ;;  %v1177_v28 = vrot.slane %v5654_v1, 6  ;;  %v1092_v36 = vrot.slane %v5654_v1, 1 }
 0x18d   : > { %4762 = vmatpush3.bf16.msra.mxu1 %v5628_v44  ;;  %4751 = vmatprep.subr.bf16.mxu0 %v5146_v14  ;;  %v5671_v2 = vpack.c.bf16 %v3569_v43, %v3568_v6  ;;  %v3571_v9 = vld [vmem:[%s5203_s30 + $0xd8] sm:$0xff]  ;;  %v5682_v57 = vpack.c.bf16 %v3562_v56, %v3561_v49  ;;  %v3563_v54 = vld [vmem:[%s5203_s30 + $0xa0] sm:$0xff]  ;;  %v3564_v12 = vld [vmem:[%s5203_s30 + $0xa8] sm:$0xff]  ;;  %v1262_v34 = vrot.slane %v5654_v1, 2 }
 0x18e   : > { %4763 = vmatprep.subr.bf16.mxu1 %v5146_v14  ;;  %v5686_v10 = vpack.c.bf16 %v3571_v9, %v3570_v47  ;;  %v3572_v13 = vld [vmem:[%s5203_s30 + $0xe0] sm:$0xff]  ;;  %v3573_v15 = vld [vmem:[%s5203_s30 + $0xe8] sm:$0xff]  ;;  %v5698_v58 = vpack.c.bf16 %v3564_v12, %v3563_v54  ;;  %v3565_v16 = vld [vmem:[%s5203_s30 + $0xb0] sm:$0xff] }
 0x18f   : > { %v5702_v3 = vpack.c.bf16 %v3573_v15, %v3572_v13  ;;  %v3566_v19 = vld [vmem:[%s5203_s30 + $0xb8] sm:$0xff]  ;;  %v3574_v20 = vld [vmem:[%s5203_s30 + $0xf0] sm:$0xff]  ;;  %v918_v59 = vld [vmem:[%s5651_s13 + $0x8] sm:$0x1] }
 0x190   : > { %4753 = vmatpush3.bf16.msra.mxu0 %v5637_v39  ;;  %v3575_v22 = vld [vmem:[%s5203_s30 + $0xf8] sm:$0xff]  ;;  %v5711_v24 = vpack.c.bf16 %v3566_v19, %v3565_v16  ;;  %v3577_v27 = vld [vmem:[%s5203_s30 + $0x100] sm:$0xff]  ;;  %v3578_v60 = vld [vmem:[%s5203_s30 + $0x108] sm:$0xff]  ;;  %v1178_v29 = vrot.slane %v918_v59, 6 }
 0x191   : > { %4765 = vmatpush3.bf16.msra.mxu1 %v5641_v48  ;;  %4754 = vmatprep.subr.bf16.mxu0 %v5146_v14  ;;  %v5715_v25 = vpack.c.bf16 %v3575_v22, %v3574_v20  ;;  %v5723_v37 = vpack.c.bf16 %v3578_v60, %v3577_v27  ;;  %v3579_v5 = vld [vmem:[%s5203_s30 + $0x110] sm:$0xff]  ;;  %v3580_v11 = vld [vmem:[%s5203_s30 + $0x118] sm:$0xff]  ;;  %v3581_v23 = vld [vmem:[%s5203_s30 + $0x120] sm:$0xff] }
 0x192   : > { %4766 = vmatprep.subr.bf16.mxu1 %v5146_v14  ;;  %v1179_v38 = vsel %vm1176_vm2, %v1177_v28, %v1178_v29  ;;  %v5734_v17 = vpack.c.bf16 %v3580_v11, %v3579_v5  ;;  %v3582_v32 = vld [vmem:[%s5203_s30 + $0x128] sm:$0xff]  ;;  %v3583_v8 = vld [vmem:[%s5203_s30 + $0x130] sm:$0xff]  ;;  %v3584_v26 = vld [vmem:[%s5203_s30 + $0x138] sm:$0xff] }
 0x193   : > { %v5746_v50 = vpack.c.bf16 %v3582_v32, %v3581_v23  ;;  %v5754_v30 = vpack.c.bf16 %v3584_v26, %v3583_v8  ;;  %v3587_v63 = vld [vmem:[%s5651_s13 + $0x20] sm:$0xff]  ;;  %v3588_v31 = vld [vmem:[%s5651_s13 + $0x28] sm:$0x1]  ;;  %v3668_v9 = vld [vmem:[%s5651_s13 + $0x98] sm:$0x1] }
 0x194   : > { %4756 = vmatpush3.bf16.msra.mxu0 %v5649_v53  ;;  %v1361_v35 = vrot.slane %v3587_v63, 5  ;;  %v1514_v0 = vrot.slane %v3587_v63, 1  ;;  %v1597_v45 = vrot.slane %v3587_v63, 6  ;;  %v1598_v42 = vrot.slane %v3588_v31, 6  ;;  %v3627_v55 = vld [vmem:[%s5651_s13 + $0x40] sm:$0xff]  ;;  %v3754_v16 = vld [vmem:[%s5203_s30 + $0x68] sm:$0xff] }
 0x195   : > { %4768 = vmatpush3.bf16.msra.mxu1 %v5658_v62  ;;  %4769 = vmatprep.subr.bf16.mxu0 %v5146_v14  ;;  %v1681_v51 = vrot.slane %v3587_v63, 2  ;;  %v1780_v52 = vrot.slane %v3627_v55, 5  ;;  %v2016_v4 = vrot.slane %v3627_v55, 6  ;;  %v1933_v6 = vrot.slane %v3627_v55, 1  ;;  %v3755_v20 = vld [vmem:[%s5203_s30 + $0x70] sm:$0xff]  ;;  %v3756_v22 = vld [vmem:[%s5203_s30 + $0x78] sm:$0xff] }
 0x196   : > { %4781 = vmatprep.subr.bf16.mxu1 %v5146_v14  ;;  %v1599_v46 = vsel %vm1176_vm2, %v1597_v45, %v1598_v42  ;;  %v2100_v49 = vrot.slane %v3627_v55, 2  ;;  %v2436_v12 = vrot.slane %v3668_v9, 6  ;;  %v5055_v59 = vpack.c.bf16 %v3756_v22, %v3755_v20  ;;  %v6005_v27 = vld [vmem:[%s5651_s13 + $0xd0] sm:$0xff]  ;;  %v3759_v60 = vld [vmem:[%s5203_s30 + $0x80] sm:$0xff]  ;;  %v3760_v28 = vld [vmem:[%s5203_s30 + $0x88] sm:$0xff] }
 0x197   : > { %4160 = vmatmul.mubr.msk.f32.vlgmr.msra.gmra.mrb[0].mxu0 %vm938_vm1, %v937_v7  ;;  %v3667_v7 = vld [vmem:[%s5651_s13 + $0x90] sm:$0xff]  ;;  %v3023_v11 = vld [vmem:[%s5203_s30 + $0x18] sm:$0xff]  ;;  %v3024_v8 = vld [vmem:[%s5203_s30 + $0x20] sm:$0xff]  ;;  %v3357_v22 = vrot.slane %v6005_v27, 2 }
 0x198   : > { %4179 = vmatmul.mubr.msk.f32.vlgmr.msra.gmra.mrb[0].mxu1 %vm938_vm1, %v5654_v1  ;;  %4771 = vmatpush3.bf16.msra.mxu0 %v5667_v40  ;;  %v3628_v1 = vld [vmem:[%s5651_s13 + $0x48] sm:$0x1]  ;;  %v2199_v56 = vrot.slane %v3667_v7, 5  ;;  %v2352_v47 = vrot.slane %v3667_v7, 1  ;;  %v2435_v54 = vrot.slane %v3667_v7, 6  ;;  %v2519_v15 = vrot.slane %v3667_v7, 2 }
 0x199   : > { %4783 = vmatpush3.bf16.msra.mxu1 %v5671_v2  ;;  %4772 = vmatprep.subr.bf16.mxu0 %v5146_v14  ;;  %v2017_v61 = vrot.slane %v3628_v1, 6  ;;  %v3022_v5 = vld [vmem:[%s5203_s30 + $0x10] sm:$0xff]  ;;  %v3762_v23 = vld [vmem:[%s5203_s30 + $0x98] sm:$0xff]  ;;  %v3025_v26 = vld [vmem:[%s5203_s30 + $0x28] sm:$0xff] }
 0x19a   : > { %4784 = vmatprep.subr.bf16.mxu1 %v5146_v14  ;;  %4197 = vmatprep.mubr.msk.f32.mxu0 %vm5147_vm0, %v5148_v18  ;;  %v2437_v13 = vsel %vm1176_vm2, %v2435_v54, %v2436_v12  ;;  %v5061_v32 = vpack.c.bf16 %v3023_v11, %v3022_v5  ;;  %v3027_v31 = vld [vmem:[%s5203_s30 + $0x38] sm:$0xff]  ;;  %v3765_v45 = vld [vmem:[%s5203_s30 + $0xb0] sm:$0xff]  ;;  %v3777_v1 = vld [vmem:[%s5203_s30 + $0x100] sm:$0xff] }
 0x19b   : > { %4216 = vmatprep.mubr.msk.f32.mxu1 %vm5147_vm0, %v5148_v18  ;;  %v2018_v43 = vsel %vm1176_vm2, %v2016_v4, %v2017_v61  ;;  %v3766_v42 = vld [vmem:[%s5203_s30 + $0xb8] sm:$0xff]  ;;  %v3778_v4 = vld [vmem:[%s5203_s30 + $0x108] sm:$0xff]  ;;  %v3772_v12 = vld [vmem:[%s5203_s30 + $0xe0] sm:$0xff] }
 0x19c   : > { %4774 = vmatpush3.bf16.msra.mxu0 %v5682_v57 }
 0x19d   : > { %4786 = vmatpush3.bf16.msra.mxu1 %v5686_v10  ;;  %4775 = vmatprep.subr.bf16.mxu0 %v5146_v14 }
 0x19e   : > { %4787 = vmatprep.subr.bf16.mxu1 %v5146_v14 }
 0x1a0   : > { %4777 = vmatpush3.bf16.msra.mxu0 %v5698_v58 }
 0x1a1   : > { %4789 = vmatpush3.bf16.msra.mxu1 %v5702_v3  ;;  %4778 = vmatprep.subr.bf16.mxu0 %v5146_v14 }
 0x1a2   : > { %4790 = vmatprep.subr.bf16.mxu1 %v5146_v14 }
 0x1a4   : > { %4780 = vmatpush3.bf16.msra.mxu0 %v5711_v24 }
 0x1a5   : > { %4792 = vmatpush3.bf16.msra.mxu1 %v5715_v25  ;;  %4793 = vmatprep.subr.bf16.mxu0 %v5146_v14 }
 0x1a6   : > { %4805 = vmatprep.subr.bf16.mxu1 %v5146_v14 }
 0x1a7   : > { %4198 = vmatmul.mubr.msk.f32.vlgmr.msra.gmra.mrb[2].mxu0 %vm938_vm1, %v1092_v36 }
 0x1a8   : > { %4795 = vmatpush3.bf16.msra.mxu0 %v5723_v37  ;;  %4217 = vmatmul.mubr.msk.f32.vlgmr.msra.gmra.mrb[2].mxu1 %vm938_vm1, %v1179_v38  ;;  %v5070_v38 = vpack.c.bf16 %v3760_v28, %v3759_v60 }
 0x1a9   : > { %4807 = vmatpush3.bf16.msra.mxu1 %v5609_v21  ;;  %4796 = vmatprep.subr.bf16.mxu0 %v5146_v14 }
 0x1aa   : > { %4808 = vmatprep.subr.bf16.mxu1 %v5146_v14  ;;  %4235 = vmatprep.mubr.msk.f32.mxu0 %vm5147_vm0, %v5148_v18 }
 0x1ab   : > { %4254 = vmatprep.mubr.msk.f32.mxu1 %vm5147_vm0, %v5148_v18 }
 0x1ac   : > { %4798 = vmatpush3.bf16.msra.mxu0 %v5734_v17 }
 0x1ad   : > { %4810 = vmatpush3.bf16.msra.mxu1 %v5624_v41  ;;  %4799 = vmatprep.subr.bf16.mxu0 %v5146_v14 }
 0x1ae   : > { %4811 = vmatprep.subr.bf16.mxu1 %v5146_v14 }
 0x1b0   : > { %4801 = vmatpush3.bf16.msra.mxu0 %v5746_v50 }
 0x1b1   : > { %4813 = vmatpush3.bf16.msra.mxu1 %v5637_v39  ;;  %4802 = vmatprep.subr.bf16.mxu0 %v5146_v14 }
 0x1b2   : > { %4814 = vmatprep.subr.bf16.mxu1 %v5146_v14 }
 0x1b4   : > { %4804 = vmatpush3.bf16.msra.mxu0 %v5754_v30 }
 0x1b5   : > { %4816 = vmatpush3.bf16.msra.mxu1 %v5649_v53  ;;  %4817 = vmatprep.subr.bf16.mxu0 %v5146_v14 }
 0x1b6   : > { %4829 = vmatprep.subr.bf16.mxu1 %v5146_v14 }
 0x1b7   : > { %4236 = vmatmul.mubr.msk.f32.vlgmr.msra.gmra.mrb[4].mxu0 %vm938_vm1, %v1262_v34  ;;  %v5064_v34 = vpack.c.bf16 %v3025_v26, %v3024_v8 }
 0x1b8   : > { %4819 = vmatpush3.bf16.msra.mxu0 %v5615_v33  ;;  %4255 = vmatmul.mubr.msk.f32.vlgmr.msra.gmra.mrb[4].mxu1 %vm938_vm1, %v1361_v35 }
 0x1b9   : > { %4831 = vmatpush3.bf16.msra.mxu1 %v5667_v40  ;;  %4820 = vmatprep.subr.bf16.mxu0 %v5146_v14 }
 0x1ba   : > { %4832 = vmatprep.subr.bf16.mxu1 %v5146_v14  ;;  %4273 = vmatprep.mubr.msk.f32.mxu0 %vm5147_vm0, %v5148_v18 }
 0x1bb   : > { %4292 = vmatprep.mubr.msk.f32.mxu1 %vm5147_vm0, %v5148_v18 }
 0x1bc   : > { %4822 = vmatpush3.bf16.msra.mxu0 %v5628_v44 }
 0x1bd   : > { %4834 = vmatpush3.bf16.msra.mxu1 %v5682_v57  ;;  %4823 = vmatprep.subr.bf16.mxu0 %v5146_v14 }
 0x1be   : > { %4835 = vmatprep.subr.bf16.mxu1 %v5146_v14 }
 0x1c0   : > { %4825 = vmatpush3.bf16.msra.mxu0 %v5641_v48 }
 0x1c1   : > { %4837 = vmatpush3.bf16.msra.mxu1 %v5698_v58  ;;  %4826 = vmatprep.subr.bf16.mxu0 %v5146_v14 }
 0x1c2   : > { %4838 = vmatprep.subr.bf16.mxu1 %v5146_v14 }
 0x1c4   : > { %4828 = vmatpush3.bf16.msra.mxu0 %v5658_v62 }
 0x1c5   : > { %4840 = vmatpush3.bf16.msra.mxu1 %v5711_v24  ;;  %4841 = vmatprep.subr.bf16.mxu0 %v5146_v14 }
 0x1c6   : > { %4853 = vmatprep.subr.bf16.mxu1 %v5146_v14 }
 0x1c7   : > { %4274 = vmatmul.mubr.msk.f32.vlgmr.msra.gmra.mrb[6].mxu0 %vm938_vm1, %v3587_v63  ;;  %v3764_v63 = vld [vmem:[%s5203_s30 + $0xa8] sm:$0xff] }
 0x1c8   : > { %4843 = vmatpush3.bf16.msra.mxu0 %v5671_v2  ;;  %4293 = vmatmul.mubr.msk.f32.vlgmr.msra.gmra.mrb[6].mxu1 %vm938_vm1, %v1514_v0  ;;  %v3026_v0 = vld [vmem:[%s5203_s30 + $0x30] sm:$0xff] }
 0x1c9   : > { %4855 = vmatpush3.bf16.msra.mxu1 %v5723_v37  ;;  %4844 = vmatprep.subr.bf16.mxu0 %v5146_v14 }
 0x1ca   : > { %4856 = vmatprep.subr.bf16.mxu1 %v5146_v14  ;;  %4311 = vmatprep.mubr.msk.f32.mxu0 %vm5147_vm0, %v5148_v18 }
 0x1cb   : > { %4330 = vmatprep.mubr.msk.f32.mxu1 %vm5147_vm0, %v5148_v18 }
 0x1cc   : > { %4846 = vmatpush3.bf16.msra.mxu0 %v5686_v10 }
 0x1cd   : > { %4858 = vmatpush3.bf16.msra.mxu1 %v5734_v17  ;;  %4847 = vmatprep.subr.bf16.mxu0 %v5146_v14 }
 0x1ce   : > { %4859 = vmatprep.subr.bf16.mxu1 %v5146_v14 }
 0x1d0   : > { %4849 = vmatpush3.bf16.msra.mxu0 %v5702_v3 }
 0x1d1   : > { %4861 = vmatpush3.bf16.msra.mxu1 %v5746_v50  ;;  %4850 = vmatprep.subr.bf16.mxu0 %v5146_v14 }
 0x1d2   : > { %4862 = vmatprep.subr.bf16.mxu1 %v5146_v14 }
 0x1d4   : > { %4852 = vmatpush3.bf16.msra.mxu0 %v5715_v25 }
 0x1d5   : > { %4864 = vmatpush3.bf16.msra.mxu1 %v5754_v30  ;;  %4865 = vmatprep.subr.bf16.mxu0 %v5146_v14 }
 0x1d6   : > { %4877 = vmatprep.subr.bf16.mxu1 %v5146_v14 }
 0x1d7   : > { %4312 = vmatmul.mubr.msk.f32.vlgmr.msra.gmra.mrb[8].mxu0 %vm938_vm1, %v1599_v46  ;;  %v5067_v46 = vpack.c.bf16 %v3027_v31, %v3026_v0  ;;  %v1755_v0 = vld [vmem:[#allocation3 + $0x3] sm:$0x7] }
 0x1d8   : > { %4867 = vmatpush3.bf16.msra.mxu0 %v5609_v21  ;;  %4331 = vmatmul.mubr.msk.f32.vlgmr.msra.gmra.mrb[8].mxu1 %vm938_vm1, %v1681_v51  ;;  %v5079_v51 = vpack.c.bf16 %v3766_v42, %v3765_v45 }
 0x1d9   : > { %4879 = vmatpush3.bf16.msra.mxu1 %v5615_v33  ;;  %4868 = vmatprep.subr.bf16.mxu0 %v5146_v14 }
 0x1da   : > { %4880 = vmatprep.subr.bf16.mxu1 %v5146_v14  ;;  %4349 = vmatprep.mubr.msk.f32.mxu0 %vm5147_vm0, %v5148_v18 }
 0x1db   : > { %4368 = vmatprep.mubr.msk.f32.mxu1 %vm5147_vm0, %v5148_v18 }
 0x1dc   : > { %4870 = vmatpush3.bf16.msra.mxu0 %v5624_v41 }
 0x1dd   : > { %4882 = vmatpush3.bf16.msra.mxu1 %v5628_v44  ;;  %4871 = vmatprep.subr.bf16.mxu0 %v5146_v14 }
 0x1de   : > { %4883 = vmatprep.subr.bf16.mxu1 %v5146_v14 }
 0x1e0   : > { %4873 = vmatpush3.bf16.msra.mxu0 %v5637_v39 }
 0x1e1   : > { %4885 = vmatpush3.bf16.msra.mxu1 %v5641_v48  ;;  %4874 = vmatprep.subr.bf16.mxu0 %v5146_v14 }
 0x1e2   : > { %4886 = vmatprep.subr.bf16.mxu1 %v5146_v14 }
 0x1e4   : > { %4876 = vmatpush3.bf16.msra.mxu0 %v5649_v53 }
 0x1e5   : > { %4888 = vmatpush3.bf16.msra.mxu1 %v5658_v62  ;;  %4889 = vmatprep.subr.bf16.mxu0 %v5146_v14 }
 0x1e6   : > { %4901 = vmatprep.subr.bf16.mxu1 %v5146_v14 }
 0x1e7   : > { %4350 = vmatmul.mubr.msk.f32.vlgmr.msra.gmra.mrb[10].mxu0 %vm938_vm1, %v1780_v52  ;;  %v3769_v52 = vld [vmem:[%s5203_s30 + $0xc8] sm:$0xff] }
 0x1e8   : > { %4369 = vmatmul.mubr.msk.f32.vlgmr.msra.gmra.mrb[10].mxu1 %vm938_vm1, %v3627_v55  ;;  %4891 = vmatpush3.bf16.msra.mxu0 %v5667_v40  ;;  %v3768_v55 = vld [vmem:[%s5203_s30 + $0xc0] sm:$0xff] }
 0x1e9   : > { %4903 = vmatpush3.bf16.msra.mxu1 %v5671_v2  ;;  %4892 = vmatprep.subr.bf16.mxu0 %v5146_v14  ;;  %v5082_v61 = vpack.c.bf16 %v3769_v52, %v3768_v55 }
 0x1ea   : > { %4904 = vmatprep.subr.bf16.mxu1 %v5146_v14  ;;  %4387 = vmatprep.mubr.msk.f32.mxu0 %vm5147_vm0, %v5148_v18 }
 0x1eb   : > { %4406 = vmatprep.mubr.msk.f32.mxu1 %vm5147_vm0, %v5148_v18 }
 0x1ec   : > { %4894 = vmatpush3.bf16.msra.mxu0 %v5682_v57 }
 0x1ed   : > { %4906 = vmatpush3.bf16.msra.mxu1 %v5686_v10  ;;  %4895 = vmatprep.subr.bf16.mxu0 %v5146_v14 }
 0x1ee   : > { %4907 = vmatprep.subr.bf16.mxu1 %v5146_v14 }
 0x1f0   : > { %4897 = vmatpush3.bf16.msra.mxu0 %v5698_v58 }
 0x1f1   : > { %4909 = vmatpush3.bf16.msra.mxu1 %v5702_v3  ;;  %4898 = vmatprep.subr.bf16.mxu0 %v5146_v14 }
 0x1f2   : > { %4910 = vmatprep.subr.bf16.mxu1 %v5146_v14 }
 0x1f4   : > { %4900 = vmatpush3.bf16.msra.mxu0 %v5711_v24 }
 0x1f5   : > { %4912 = vmatpush3.bf16.msra.mxu1 %v5715_v25  ;;  %4913 = vmatprep.subr.bf16.mxu0 %v5146_v14 }
 0x1f6   : > { %4925 = vmatprep.subr.bf16.mxu1 %v5146_v14 }
 0x1f7   : > { %4388 = vmatmul.mubr.msk.f32.vlgmr.msra.gmra.mrb[12].mxu0 %vm938_vm1, %v1933_v6  ;;  %v3190_v6 = vrot.slane %v6005_v27, 1 }
 0x1f8   : > { %4915 = vmatpush3.bf16.msra.mxu0 %v5723_v37  ;;  %4407 = vmatmul.mubr.msk.f32.vlgmr.msra.gmra.mrb[12].mxu1 %vm938_vm1, %v2018_v43  ;;  %v5094_v43 = vpack.c.bf16 %v3778_v4, %v3777_v1 }
 0x1f9   : > { %4927 = vmatpush3.bf16.msra.mxu1 %v5609_v21  ;;  %4916 = vmatprep.subr.bf16.mxu0 %v5146_v14 }
 0x1fa   : > { %4928 = vmatprep.subr.bf16.mxu1 %v5146_v14  ;;  %4425 = vmatprep.mubr.msk.f32.mxu0 %vm5147_vm0, %v5148_v18 }
 0x1fb   : > { %4444 = vmatprep.mubr.msk.f32.mxu1 %vm5147_vm0, %v5148_v18 }
 0x1fc   : > { %4918 = vmatpush3.bf16.msra.mxu0 %v5734_v17 }
 0x1fd   : > { %4930 = vmatpush3.bf16.msra.mxu1 %v5624_v41  ;;  %4919 = vmatprep.subr.bf16.mxu0 %v5146_v14 }
 0x1fe   : > { %4931 = vmatprep.subr.bf16.mxu1 %v5146_v14 }
 0x200   : > { %4921 = vmatpush3.bf16.msra.mxu0 %v5746_v50 }
 0x201   : > { %4933 = vmatpush3.bf16.msra.mxu1 %v5637_v39  ;;  %4922 = vmatprep.subr.bf16.mxu0 %v5146_v14 }
 0x202   : > { %4934 = vmatprep.subr.bf16.mxu1 %v5146_v14 }
 0x204   : > { %4924 = vmatpush3.bf16.msra.mxu0 %v5754_v30 }
 0x205   : > { %4936 = vmatpush3.bf16.msra.mxu1 %v5649_v53  ;;  %4937 = vmatprep.subr.bf16.mxu0 %v5146_v14 }
 0x206   : > { %4949 = vmatprep.subr.bf16.mxu1 %v5146_v14 }
 0x207   : > { %4426 = vmatmul.mubr.msk.f32.vlgmr.msra.gmra.mrb[14].mxu0 %vm938_vm1, %v2100_v49  ;;  %v3771_v49 = vld [vmem:[%s5203_s30 + $0xd8] sm:$0xff] }
 0x208   : > { %4939 = vmatpush3.bf16.msra.mxu0 %v5615_v33  ;;  %4445 = vmatmul.mubr.msk.f32.vlgmr.msra.gmra.mrb[14].mxu1 %vm938_vm1, %v2199_v56  ;;  %v3779_v56 = vld [vmem:[%s5203_s30 + $0x110] sm:$0xff] }
 0x209   : > { %4951 = vmatpush3.bf16.msra.mxu1 %v5667_v40  ;;  %4940 = vmatprep.subr.bf16.mxu0 %v5146_v14 }
 0x20a   : > { %4952 = vmatprep.subr.bf16.mxu1 %v5146_v14  ;;  %4463 = vmatprep.mubr.msk.f32.mxu0 %vm5147_vm0, %v5148_v18 }
 0x20b   : > { %4482 = vmatprep.mubr.msk.f32.mxu1 %vm5147_vm0, %v5148_v18 }
 0x20c   : > { %4942 = vmatpush3.bf16.msra.mxu0 %v5628_v44 }
 0x20d   : > { %4954 = vmatpush3.bf16.msra.mxu1 %v5682_v57  ;;  %4943 = vmatprep.subr.bf16.mxu0 %v5146_v14 }
 0x20e   : > { %4955 = vmatprep.subr.bf16.mxu1 %v5146_v14 }
 0x210   : > { %4945 = vmatpush3.bf16.msra.mxu0 %v5641_v48 }
 0x211   : > { %4957 = vmatpush3.bf16.msra.mxu1 %v5698_v58  ;;  %4946 = vmatprep.subr.bf16.mxu0 %v5146_v14 }
 0x212   : > { %4958 = vmatprep.subr.bf16.mxu1 %v5146_v14 }
 0x214   : > { %4948 = vmatpush3.bf16.msra.mxu0 %v5658_v62 }
 0x215   : > { %4960 = vmatpush3.bf16.msra.mxu1 %v5711_v24  ;;  %4961 = vmatprep.subr.bf16.mxu0 %v5146_v14 }
 0x216   : > { %4973 = vmatprep.subr.bf16.mxu1 %v5146_v14 }
 0x217   : > { %4464 = vmatmul.mubr.msk.f32.vlgmr.msra.gmra.mrb[16].mxu0 %vm938_vm1, %v3667_v7  ;;  %v3770_v7 = vld [vmem:[%s5203_s30 + $0xd0] sm:$0xff] }
 0x218   : > { %4963 = vmatpush3.bf16.msra.mxu0 %v5671_v2  ;;  %4483 = vmatmul.mubr.msk.f32.vlgmr.msra.gmra.mrb[16].mxu1 %vm938_vm1, %v2352_v47  ;;  %v3780_v47 = vld [vmem:[%s5203_s30 + $0x118] sm:$0xff]  ;;  %v5085_v9 = vpack.c.bf16 %v3771_v49, %v3770_v7 }
 0x219   : > { %4975 = vmatpush3.bf16.msra.mxu1 %v5723_v37  ;;  %4964 = vmatprep.subr.bf16.mxu0 %v5146_v14  ;;  %v5097_v54 = vpack.c.bf16 %v3780_v47, %v3779_v56  ;;  %v2174_v47 = vld [vmem:[#allocation3 + $0x6] sm:$0x7] }
 0x21a   : > { %4976 = vmatprep.subr.bf16.mxu1 %v5146_v14  ;;  %4501 = vmatprep.mubr.msk.f32.mxu0 %vm5147_vm0, %v5148_v18 }
 0x21b   : > { %4520 = vmatprep.mubr.msk.f32.mxu1 %vm5147_vm0, %v5148_v18 }
 0x21c   : > { %4966 = vmatpush3.bf16.msra.mxu0 %v5686_v10 }
 0x21d   : > { %4978 = vmatpush3.bf16.msra.mxu1 %v5734_v17  ;;  %4967 = vmatprep.subr.bf16.mxu0 %v5146_v14 }
 0x21e   : > { %4979 = vmatprep.subr.bf16.mxu1 %v5146_v14 }
 0x220   : > { %4969 = vmatpush3.bf16.msra.mxu0 %v5702_v3 }
 0x221   : > { %4981 = vmatpush3.bf16.msra.mxu1 %v5746_v50  ;;  %4970 = vmatprep.subr.bf16.mxu0 %v5146_v14 }
 0x222   : > { %4982 = vmatprep.subr.bf16.mxu1 %v5146_v14 }
 0x224   : > { %4972 = vmatpush3.bf16.msra.mxu0 %v5715_v25 }
 0x225   : > { %4984 = vmatpush3.bf16.msra.mxu1 %v5754_v30  ;;  %4985 = vmatprep.subr.bf16.mxu0 %v5146_v14 }
 0x226   : > { %4997 = vmatprep.subr.bf16.mxu1 %v5146_v14 }
 0x227   : > { %4502 = vmatmul.mubr.msk.f32.vlgmr.msra.gmra.mrb[18].mxu0 %vm938_vm1, %v2437_v13  ;;  %v3773_v13 = vld [vmem:[%s5203_s30 + $0xe8] sm:$0xff] }
 0x228   : > { %4987 = vmatpush3.bf16.msra.mxu0 %v5609_v21  ;;  %4521 = vmatmul.mubr.msk.f32.vlgmr.msra.gmra.mrb[18].mxu1 %vm938_vm1, %v2519_v15  ;;  %v5943_v21 = vld [vmem:[%s5651_s13 + $0xb0] sm:$0xff] }
 0x229   : > { %4999 = vmatpush3.bf16.msra.mxu1 %v5615_v33  ;;  %4988 = vmatprep.subr.bf16.mxu0 %v5146_v14  ;;  %v2618_v33 = vrot.slane %v5943_v21, 5  ;;  %v2938_v29 = vrot.slane %v5943_v21, 2 }
 0x22a   : > { %5000 = vmatprep.subr.bf16.mxu1 %v5146_v14  ;;  %4539 = vmatprep.mubr.msk.f32.mxu0 %vm5147_vm0, %v5148_v18 }
 0x22b   : > { %4558 = vmatprep.mubr.msk.f32.mxu1 %vm5147_vm0, %v5148_v18 }
 0x22c   : > { %4990 = vmatpush3.bf16.msra.mxu0 %v5624_v41  ;;  %v3708_v41 = vld [vmem:[%s5651_s13 + $0xb8] sm:$0x1] }
 0x22d   : > { %5002 = vmatpush3.bf16.msra.mxu1 %v5628_v44  ;;  %4991 = vmatprep.subr.bf16.mxu0 %v5146_v14  ;;  %v2854_v44 = vrot.slane %v5943_v21, 6 }
 0x22e   : > { %5003 = vmatprep.subr.bf16.mxu1 %v5146_v14 }
 0x230   : > { %4993 = vmatpush3.bf16.msra.mxu0 %v5637_v39  ;;  %v2855_v39 = vrot.slane %v3708_v41, 6 }
 0x231   : > { %5005 = vmatpush3.bf16.msra.mxu1 %v5641_v48  ;;  %4994 = vmatprep.subr.bf16.mxu0 %v5146_v14  ;;  %v3749_v48 = vld [vmem:[%s5203_s30 + $0x40] sm:$0xff] }
 0x232   : > { %5006 = vmatprep.subr.bf16.mxu1 %v5146_v14 }
 0x234   : > { %4996 = vmatpush3.bf16.msra.mxu0 %v5649_v53  ;;  %v3750_v53 = vld [vmem:[%s5203_s30 + $0x48] sm:$0xff] }
 0x235   : > { %5008 = vmatpush3.bf16.msra.mxu1 %v5658_v62  ;;  %5009 = vmatprep.subr.bf16.mxu0 %v5146_v14  ;;  %v2771_v62 = vrot.slane %v5943_v21, 1 }
 0x236   : > { %5021 = vmatprep.subr.bf16.mxu1 %v5146_v14 }
 0x237   : > { %4540 = vmatmul.mubr.msk.f32.vlgmr.msra.gmra.mrb[20].mxu0 %vm938_vm1, %v2618_v33  ;;  %v3782_v33 = vld [vmem:[%s5203_s30 + $0x128] sm:$0xff] }
 0x238   : > { %4559 = vmatmul.mubr.msk.f32.vlgmr.msra.gmra.mrb[20].mxu1 %vm938_vm1, %v5943_v21  ;;  %5011 = vmatpush3.bf16.msra.mxu0 %v5667_v40  ;;  %v2856_v40 = vsel %vm1176_vm2, %v2854_v44, %v2855_v39  ;;  %v3781_v21 = vld [vmem:[%s5203_s30 + $0x120] sm:$0xff] }
 0x239   : > { %5023 = vmatpush3.bf16.msra.mxu1 %v5671_v2  ;;  %5012 = vmatprep.subr.bf16.mxu0 %v5146_v14  ;;  %v5046_v2 = vpack.c.bf16 %v3750_v53, %v3749_v48  ;;  %v5088_v53 = vpack.c.bf16 %v3773_v13, %v3772_v12 }
 0x23a   : > { %5024 = vmatprep.subr.bf16.mxu1 %v5146_v14  ;;  %4577 = vmatprep.mubr.msk.f32.mxu0 %vm5147_vm0, %v5148_v18 }
 0x23b   : > { %4596 = vmatprep.mubr.msk.f32.mxu1 %vm5147_vm0, %v5148_v18 }
 0x23c   : > { %5014 = vmatpush3.bf16.msra.mxu0 %v5682_v57  ;;  %v3751_v57 = vld [vmem:[%s5203_s30 + $0x50] sm:$0xff] }
 0x23d   : > { %5026 = vmatpush3.bf16.msra.mxu1 %v5686_v10  ;;  %5015 = vmatprep.subr.bf16.mxu0 %v5146_v14  ;;  %v3752_v10 = vld [vmem:[%s5203_s30 + $0x58] sm:$0xff] }
 0x23e   : > { %5027 = vmatprep.subr.bf16.mxu1 %v5146_v14 }
 0x240   : > { %5017 = vmatpush3.bf16.msra.mxu0 %v5698_v58  ;;  %v5049_v58 = vpack.c.bf16 %v3752_v10, %v3751_v57  ;;  %v3748_v57 = vld [vmem:[%s5651_s13 + $0xd8] sm:$0x1]  ;;  %v3783_v10 = vld [vmem:[%s5203_s30 + $0x130] sm:$0xff] }
 0x241   : > { %5029 = vmatpush3.bf16.msra.mxu1 %v5702_v3  ;;  %5018 = vmatprep.subr.bf16.mxu0 %v5146_v14  ;;  %v3753_v3 = vld [vmem:[%s5203_s30 + $0x60] sm:$0xff] }
 0x242   : > { %5030 = vmatprep.subr.bf16.mxu1 %v5146_v14  ;;  %v5052_v19 = vpack.c.bf16 %v3754_v16, %v3753_v3  ;;  %v3273_v16 = vrot.slane %v6005_v27, 6 }
 0x244   : > { %5020 = vmatpush3.bf16.msra.mxu0 %v5711_v24  ;;  %v3020_v24 = vld [vmem:[%s5203_s30] sm:$0xff] }
 0x245   : > { %5032 = vmatpush3.bf16.msra.mxu1 %v5715_v25  ;;  %5033 = vmatprep.subr.bf16.mxu0 %v5146_v14  ;;  %v3021_v25 = vld [vmem:[%s5203_s30 + $0x8] sm:$0xff] }
 0x246   : > { %5045 = vmatprep.subr.bf16.mxu1 %v5146_v14  ;;  %v5058_v36 = vpack.c.bf16 %v3021_v25, %v3020_v24 }
 0x247   : > { %4578 = vmatmul.mubr.msk.f32.vlgmr.msra.gmra.mrb[22].mxu0 %vm938_vm1, %v2771_v62  ;;  %v5100_v62 = vpack.c.bf16 %v3782_v33, %v3781_v21 }
 0x248   : > { %5035 = vmatpush3.bf16.msra.mxu0 %v5723_v37  ;;  %4597 = vmatmul.mubr.msk.f32.vlgmr.msra.gmra.mrb[22].mxu1 %vm938_vm1, %v2856_v40  ;;  %v3037_v37 = vrot.slane %v6005_v27, 5  ;;  %v3774_v40 = vld [vmem:[%s5203_s30 + $0xf0] sm:$0xff] }
 0x249   : > { %5047 = vmatpush3.bf16.msra.mxu1 %v5046_v2  ;;  %5036 = vmatprep.subr.bf16.mxu0 %v5146_v14  ;;  %v3775_v2 = vld [vmem:[%s5203_s30 + $0xf8] sm:$0xff] }
 0x24a   : > { %5048 = vmatprep.subr.bf16.mxu1 %v5146_v14  ;;  %4615 = vmatprep.mubr.msk.f32.mxu0 %vm5147_vm0, %v5148_v18  ;;  %v5091_v3 = vpack.c.bf16 %v3775_v2, %v3774_v40 }
 0x24b   : > { %4634 = vmatprep.mubr.msk.f32.mxu1 %vm5147_vm0, %v5148_v18 }
 0x24c   : > { %5038 = vmatpush3.bf16.msra.mxu0 %v5734_v17  ;;  %v3761_v17 = vld [vmem:[%s5203_s30 + $0x90] sm:$0xff] }
 0x24d   : > { %5050 = vmatpush3.bf16.msra.mxu1 %v5049_v58  ;;  %5039 = vmatprep.subr.bf16.mxu0 %v5146_v14  ;;  %v3784_v58 = vld [vmem:[%s5203_s30 + $0x138] sm:$0xff] }
 0x24e   : > { %5051 = vmatprep.subr.bf16.mxu1 %v5146_v14 }
 0x250   : > { %5041 = vmatpush3.bf16.msra.mxu0 %v5746_v50  ;;  %v5073_v50 = vpack.c.bf16 %v3762_v23, %v3761_v17 }
 0x251   : > { %5053 = vmatpush3.bf16.msra.mxu1 %v5052_v19  ;;  %5042 = vmatprep.subr.bf16.mxu0 %v5146_v14  ;;  %v5103_v19 = vpack.c.bf16 %v3784_v58, %v3783_v10 }
 0x252   : > { %5054 = vmatprep.subr.bf16.mxu1 %v5146_v14 }
 0x254   : > { %5044 = vmatpush3.bf16.msra.mxu0 %v5754_v30  ;;  %v3763_v30 = vld [vmem:[%s5203_s30 + $0xa0] sm:$0xff] }
 0x255   : > { %5056 = vmatpush3.bf16.msra.mxu1 %v5055_v59  ;;  %5057 = vmatprep.subr.bf16.mxu0 %v5146_v14  ;;  %v5076_v35 = vpack.c.bf16 %v3764_v63, %v3763_v30 }
 0x256   : > { %5069 = vmatprep.subr.bf16.mxu1 %v5146_v14 }
 0x257   : > { %4616 = vmatmul.mubr.msk.f32.vlgmr.msra.gmra.mrb[24].mxu0 %vm938_vm1, %v2938_v29 }
 0x258   : > { %5059 = vmatpush3.bf16.msra.mxu0 %v5058_v36  ;;  %4635 = vmatmul.mubr.msk.f32.vlgmr.msra.gmra.mrb[24].mxu1 %vm938_vm1, %v3037_v37  ;;  %v1336_v37 = vld [vmem:[#allocation3] sm:$0x7] }
 0x259   : > { %5071 = vmatpush3.bf16.msra.mxu1 %v5070_v38  ;;  %5060 = vmatprep.subr.bf16.mxu0 %v5146_v14 }
 0x25a   : > { %5072 = vmatprep.subr.bf16.mxu1 %v5146_v14  ;;  %4653 = vmatprep.mubr.msk.f32.mxu0 %vm5147_vm0, %v5148_v18 }
 0x25b   : > { %4672 = vmatprep.mubr.msk.f32.mxu1 %vm5147_vm0, %v5148_v18 }
 0x25c   : > { %5062 = vmatpush3.bf16.msra.mxu0 %v5061_v32 }
 0x25d   : > { %5074 = vmatpush3.bf16.msra.mxu1 %v5073_v50  ;;  %5063 = vmatprep.subr.bf16.mxu0 %v5146_v14 }
 0x25e   : > { %5075 = vmatprep.subr.bf16.mxu1 %v5146_v14 }
 0x260   : > { %5065 = vmatpush3.bf16.msra.mxu0 %v5064_v34 }
 0x261   : > { %5077 = vmatpush3.bf16.msra.mxu1 %v5076_v35  ;;  %5066 = vmatprep.subr.bf16.mxu0 %v5146_v14 }
 0x262   : > { %5078 = vmatprep.subr.bf16.mxu1 %v5146_v14 }
 0x264   : > { %5068 = vmatpush3.bf16.msra.mxu0 %v5067_v46 }
 0x265   : > { %5080 = vmatpush3.bf16.msra.mxu1 %v5079_v51  ;;  %5081 = vmatprep.subr.bf16.mxu0 %v5146_v14 }
 0x266   : > { %5093 = vmatprep.subr.bf16.mxu1 %v5146_v14 }
 0x267   : > { %4654 = vmatmul.mubr.msk.f32.vlgmr.msra.gmra.mrb[26].mxu0 %vm938_vm1, %v6005_v27 }
 0x268   : > { %5083 = vmatpush3.bf16.msra.mxu0 %v5082_v61  ;;  %4673 = vmatmul.mubr.msk.f32.vlgmr.msra.gmra.mrb[26].mxu1 %vm938_vm1, %v3190_v6 }
 0x269   : > { %5095 = vmatpush3.bf16.msra.mxu1 %v5094_v43  ;;  %5084 = vmatprep.subr.bf16.mxu0 %v5146_v14 }
 0x26a   : > { %v1007_v15 = vpop.f32.mrb[0].mxu0  ;;  %5096 = vmatprep.subr.bf16.mxu1 %v5146_v14  ;;  %4691 = vmatprep.mubr.msk.f32.mxu0 %vm5147_vm0, %v5148_v18 }
 0x26b   : > { %v4161_v41 = vpop.f32.mrb[1].mxu0  ;;  %v1079_v44 = vpop.f32.mrb[0].mxu1  ;;  %4710 = vmatprep.mubr.msk.f32.mxu1 %vm5147_vm0, %v5148_v18  ;;  %v3274_v18 = vrot.slane %v3748_v57, 6  ;;  %v2593_v57 = vld [vmem:[#allocation3 + $0x9] sm:$0x7] }
 0x26c   : > { %v1080_v39 = vadd.f32 %v1079_v44, %v1007_v15  ;;  %5086 = vmatpush3.bf16.msra.mxu0 %v5085_v9  ;;  %v4180_v48 = vpop.f32.mrb[1].mxu1 }
 0x26d   : > { %5098 = vmatpush3.bf16.msra.mxu1 %v5097_v54  ;;  %5087 = vmatprep.subr.bf16.mxu0 %v5146_v14  ;;  %v3275_v20 = vsel %vm1176_vm2, %v3273_v16, %v3274_v18 }
 0x26e   : > { %5099 = vmatprep.subr.bf16.mxu1 %v5146_v14 }
 0x270   : > { %5089 = vmatpush3.bf16.msra.mxu0 %v5088_v53 }
 0x271   : > { %5101 = vmatpush3.bf16.msra.mxu1 %v5100_v62  ;;  %5090 = vmatprep.subr.bf16.mxu0 %v5146_v14 }
 0x272   : > { %5102 = vmatprep.subr.bf16.mxu1 %v5146_v14 }
 0x274   : > { %5092 = vmatpush3.bf16.msra.mxu0 %v5091_v3 }
 0x275   : > { %5104 = vmatpush3.bf16.msra.mxu1 %v5103_v19 }
 0x277   : > { %4692 = vmatmul.mubr.msk.f32.vlgmr.msra.gmra.mrb[28].mxu0 %vm938_vm1, %v3275_v20 }
 0x278   : > { %4711 = vmatmul.mubr.msk.f32.vlgmr.msra.gmra.mrb[28].mxu1 %vm938_vm1, %v3357_v22 }
 0x27a   : > { %v1161_v59 = vpop.f32.mrb[2].mxu0 }
 0x27b   : > { %v1165_v24 = vadd.f32 %v1161_v59, %v1080_v39  ;;  %v4199_v25 = vpop.f32.mrb[3].mxu0  ;;  %v1248_v60 = vpop.f32.mrb[2].mxu1 }
 0x27c   : > { %v4218_v28 = vpop.f32.mrb[3].mxu1 }
 0x27d   : > { %v1252_v29 = vadd.f32 %v1248_v60, %v1165_v24 }
 0x28a   : > { %v1331_v36 = vpop.f32.mrb[4].mxu0 }
 0x28b   : > { %v1335_v38 = vadd.f32 %v1331_v36, %v1252_v29  ;;  %v4237_v14 = vpop.f32.mrb[5].mxu0  ;;  %v1430_v5 = vpop.f32.mrb[4].mxu1 }
 0x28c   : > { %v4256_v11 = vpop.f32.mrb[5].mxu1 }
 0x28d   : > { %v1337_v17 = vadd.f32 %v1336_v37, %v1335_v38  ;;  %v3012_v37 = vld [vmem:[#allocation3 + $0xc] sm:$0x7] }
 0x28f   : > { %1338 = vst [vmem:[#allocation3] sm:$0x7] %v1337_v17 }
 0x29a   : > { %v1502_v27 = vpop.f32.mrb[6].mxu0 }
 0x29b   : > { %v1503_v23 = vadd.f32 %v1502_v27, %v1430_v5  ;;  %v4275_v32 = vpop.f32.mrb[7].mxu0  ;;  %v1583_v50 = vpop.f32.mrb[6].mxu1 }
 0x29c   : > { %v4294_v8 = vpop.f32.mrb[7].mxu1 }
 0x29d   : > { %v1587_v26 = vadd.f32 %v1583_v50, %v1503_v23 }
 0x2aa   : > { %v1668_v30 = vpop.f32.mrb[8].mxu0 }
 0x2ab   : > { %v1672_v63 = vadd.f32 %v1668_v30, %v1587_v26  ;;  %v4313_v34 = vpop.f32.mrb[9].mxu0  ;;  %v1750_v35 = vpop.f32.mrb[8].mxu1 }
 0x2ac   : > { %v4332_v31 = vpop.f32.mrb[9].mxu1 }
 0x2ad   : > { %v1754_v45 = vadd.f32 %v1750_v35, %v1672_v63 }
 0x2af   : > { %v1756_v42 = vadd.f32 %v1755_v0, %v1754_v45  ;;  %v3431_v0 = vld [vmem:[#allocation3 + $0xf] sm:$0x7] }
 0x2b1   : > { %1757 = vst [vmem:[#allocation3 + $0x3] sm:$0x7] %v1756_v42 }
 0x2ba   : > { %v1849_v46 = vpop.f32.mrb[10].mxu0 }
 0x2bb   : > { %v4351_v51 = vpop.f32.mrb[11].mxu0  ;;  %v1921_v55 = vpop.f32.mrb[10].mxu1 }
 0x2bc   : > { %v1922_v52 = vadd.f32 %v1921_v55, %v1849_v46  ;;  %v4370_v1 = vpop.f32.mrb[11].mxu1 }
 0x2ca   : > { %v2002_v4 = vpop.f32.mrb[12].mxu0 }
 0x2cb   : > { %v2006_v61 = vadd.f32 %v2002_v4, %v1922_v52  ;;  %v4389_v6 = vpop.f32.mrb[13].mxu0  ;;  %v2087_v43 = vpop.f32.mrb[12].mxu1 }
 0x2cc   : > { %v4408_v7 = vpop.f32.mrb[13].mxu1 }
 0x2cd   : > { %v2091_v49 = vadd.f32 %v2087_v43, %v2006_v61 }
 0x2da   : > { %v2169_v56 = vpop.f32.mrb[14].mxu0 }
 0x2db   : > { %v2173_v9 = vadd.f32 %v2169_v56, %v2091_v49  ;;  %v4427_v54 = vpop.f32.mrb[15].mxu0  ;;  %v2268_v12 = vpop.f32.mrb[14].mxu1 }
 0x2dc   : > { %v4446_v13 = vpop.f32.mrb[15].mxu1 }
 0x2dd   : > { %v2175_v15 = vadd.f32 %v2174_v47, %v2173_v9 }
 0x2df   : > { %2176 = vst [vmem:[#allocation3 + $0x6] sm:$0x7] %v2175_v15 }
 0x2e6   : > { %v3438_v46 = vld [vmem:[#allocation3] sm:$0xff] (!%p3786_p5) }
 0x2ea   : > { %v2340_v21 = vpop.f32.mrb[16].mxu0 }
 0x2eb   : > { %v2341_v33 = vadd.f32 %v2340_v21, %v2268_v12  ;;  %v4465_v41 = vpop.f32.mrb[17].mxu0  ;;  %v2421_v44 = vpop.f32.mrb[16].mxu1 }
 0x2ec   : > { %v4484_v39 = vpop.f32.mrb[17].mxu1 }
 0x2ed   : > { %v2425_v48 = vadd.f32 %v2421_v44, %v2341_v33 }
 0x2fa   : > { %v2506_v53 = vpop.f32.mrb[18].mxu0 }
 0x2fb   : > { %v2510_v62 = vadd.f32 %v2506_v53, %v2425_v48  ;;  %v4503_v40 = vpop.f32.mrb[19].mxu0  ;;  %v2588_v2 = vpop.f32.mrb[18].mxu1 }
 0x2fc   : > { %v4522_v10 = vpop.f32.mrb[19].mxu1 }
 0x2fd   : > { %v2592_v58 = vadd.f32 %v2588_v2, %v2510_v62 }
 0x2ff   : > { %v2594_v3 = vadd.f32 %v2593_v57, %v2592_v58  ;;  %v3474_v58 = vlaneseq (!%p3786_p5) }
 0x301   : > { %2595 = vst [vmem:[#allocation3 + $0x9] sm:$0x7] %v2594_v3  ;;  %v3475_v3 = vshrl.u32 (!%p3786_p5), %v3474_v58, 7 }
 0x30a   : > { %v2687_v16 = vpop.f32.mrb[20].mxu0 }
 0x30b   : > { %v4541_v18 = vpop.f32.mrb[21].mxu0  ;;  %v2759_v19 = vpop.f32.mrb[20].mxu1 }
 0x30c   : > { %v2760_v20 = vadd.f32 %v2759_v19, %v2687_v16  ;;  %v4560_v22 = vpop.f32.mrb[21].mxu1  ;;  %v3469_v16 = vld [vmem:[%s6103_s5] sm:$0x1] (!%p3786_p5)  ;;  %v3476_v18 = vsub.s32 (!%p3786_p5), 0, %v3475_v3 }
 0x30d   : > { %v3471_v22 = vld [vmem:[%s6104_s6] sm:$0x1] (!%p3786_p5) }
 0x31a   : > { %v2840_v59 = vpop.f32.mrb[22].mxu0 }
 0x31b   : > { %v2844_v24 = vadd.f32 %v2840_v59, %v2760_v20  ;;  %v4579_v25 = vpop.f32.mrb[23].mxu0  ;;  %v2925_v60 = vpop.f32.mrb[22].mxu1 }
 0x31c   : > { %v4598_v28 = vpop.f32.mrb[23].mxu1 }
 0x31d   : > { %v2929_v29 = vadd.f32 %v2925_v60, %v2844_v24 }
 0x32a   : > { %v3007_v36 = vpop.f32.mrb[24].mxu0 }
 0x32b   : > { %v3011_v38 = vadd.f32 %v3007_v36, %v2929_v29  ;;  %v4617_v14 = vpop.f32.mrb[25].mxu0  ;;  %v3106_v5 = vpop.f32.mrb[24].mxu1 }
 0x32c   : > { %v4636_v11 = vpop.f32.mrb[25].mxu1 }
 0x32d   : > { %v3013_v17 = vadd.f32 %v3012_v37, %v3011_v38 }
 0x32f   : > { %3014 = vst [vmem:[#allocation3 + $0xc] sm:$0x7] %v3013_v17 }
 0x33a   : > { %v3178_v27 = vpop.f32.mrb[26].mxu0 }
 0x33b   : > { %v3179_v23 = vadd.f32 %v3178_v27, %v3106_v5  ;;  %v4655_v32 = vpop.f32.mrb[27].mxu0  ;;  %v3259_v50 = vpop.f32.mrb[26].mxu1 }
 0x33c   : > { %v4674_v8 = vpop.f32.mrb[27].mxu1 }
 0x33d   : > { %v3263_v26 = vadd.f32 %v3259_v50, %v3179_v23 }
 0x34a   : > { %v3344_v30 = vpop.f32.mrb[28].mxu0 }
 0x34b   : > { %v3348_v63 = vadd.f32 %v3344_v30, %v3263_v26  ;;  %v4693_v34 = vpop.f32.mrb[29].mxu0  ;;  %v3426_v35 = vpop.f32.mrb[28].mxu1  ;;  %3437 = sbr.rel (%p3786_p5) target bundleno = 924 (0x39c), region = 56 }
 0x34c   : > { %v4712_v31 = vpop.f32.mrb[29].mxu1 }
 0x34d   : > { %v3430_v45 = vadd.f32 %v3426_v35, %v3348_v63 }
 0x34f   : > { %v3432_v42 = vadd.f32 %v3431_v0, %v3430_v45 }
 0x351   : > { %3433 = vst [vmem:[#allocation3 + $0xf] sm:$0x7] %v3432_v42 }
 0x358   : > { %v3439_v51 = vld [vmem:[#allocation3 + $0x8] sm:$0xff]  ;;  %v3440_v55 = vld [vmem:[#allocation3 + $0x10] sm:$0x3] }
 0x359   : > { %v3441_v52 = vadd.f32 %v3439_v51, %v3438_v46  ;;  %v3442_v1 = vsel %vm1176_vm2, %v3440_v55, 0.0 }
 0x35b   : > { %v3443_v4 = vadd.f32 %v3442_v1, %v3441_v52 }
 0x35d   : > { %v3444_v61 = vrot.slane %v3443_v4, 4 }
 0x35f   : > { %v3445_v6 = vadd.f32 %v3444_v61, %v3443_v4 }
 0x361   : > { %v3446_v43 = vrot.slane %v3445_v6, 2 }
 0x363   : > { %v3447_v7 = vadd.f32 %v3446_v43, %v3445_v6 }
 0x365   : > { %v3448_v49 = vrot.slane %v3447_v7, 1 }
 0x367   : > { %v3449_v56 = vadd.f32 %v3448_v49, %v3447_v7 }
 0x369   : > { %v3450_v47 = vmul.f32 0.055555556, %v3449_v56 }
 0x36b   : > { %v3451_v9 = vsub.f32 %v3438_v46, %v3450_v47  ;;  %v3452_v54 = vsub.f32 %v3439_v51, %v3450_v47  ;;  %v3453_v12 = vsub.f32 %v3440_v55, %v3450_v47 }
 0x36d   : > { %v3454_v13 = vmul.f32 %v3451_v9, %v3451_v9  ;;  %v3455_v15 = vmul.f32 %v3452_v54, %v3452_v54  ;;  %v3456_v21 = vmul.f32 %v3453_v12, %v3453_v12 }
 0x36f   : > { %v3457_v33 = vadd.f32 %v3455_v15, %v3454_v13  ;;  %v3458_v41 = vsel %vm1176_vm2, %v3456_v21, 0.0 }
 0x371   : > { %v3459_v44 = vadd.f32 %v3458_v41, %v3457_v33 }
 0x373   : > { %v3460_v39 = vrot.slane %v3459_v44, 4 }
 0x375   : > { %v3461_v48 = vadd.f32 %v3460_v39, %v3459_v44 }
 0x377   : > { %v3462_v53 = vrot.slane %v3461_v48, 2 }
 0x379   : > { %v3463_v62 = vadd.f32 %v3462_v53, %v3461_v48 }
 0x37b   : > { %v3464_v40 = vrot.slane %v3463_v62, 1 }
 0x37d   : > { %v3465_v2 = vadd.f32 %v3464_v40, %v3463_v62 }
 0x37f   : > { %v3466_v57 = vmul.f32 0.055555556, %v3465_v2 }
 0x381   : > { %v3467_v10 = vadd.f32 1e-05, %v3466_v57 }
 0x383   : > { %5135 = vrsqrt.f32 %v3467_v10 }
 0x38d   : > { %v5136_v19 = vpop.eup %5135 }
 0x38e   : > { %v3470_v20 = vmul.f32 %v5136_v19, %v3469_v16 }
 0x390   : > { %v3472_v59 = vmul.f32 %v3470_v20, %v3450_v47  ;;  %v3477_v24 = vrot.slane %v3470_v20, %v3476_v18 }
 0x392   : > { %v3473_v25 = vsub.f32 %v3471_v22, %v3472_v59  ;;  %v3478_v60 = vmul.f32 %v3477_v24, %v3438_v46  ;;  %v3479_v28 = vmul.f32 %v3477_v24, %v3439_v51  ;;  %v3480_v29 = vmul.f32 %v3477_v24, %v3440_v55 }
 0x394   : > { %v3485_v36 = vrot.slane %v3473_v25, %v3476_v18 }
 0x396   : > { %v3487_v37 = vadd.f32 %v3485_v36, %v3478_v60  ;;  %v3488_v38 = vadd.f32 %v3485_v36, %v3479_v28  ;;  %v3489_v14 = vadd.f32 %v3485_v36, %v3480_v29 }
 0x398   : > { %v3490_v5 = vmax.f32 %v3487_v37, 0.0  ;;  %v3491_v11 = vmax.f32 %v3488_v38, 0.0  ;;  %v3492_v17 = vmax.f32 %v3489_v14, 0.0 }
 0x39a   : > { %3493 = vst [vmem:[%s6105_s7] sm:$0xff] %v3490_v5  ;;  %3494 = vst [vmem:[%s6105_s7 + $0x8] sm:$0xff] %v3491_v11 }
 0x39b   : > { %3495 = vst [vmem:[%s6105_s7 + $0x10] sm:$0x3] %v3492_v17 }
 0x39c PF: > { %s17_s24 = sadd.s32 1, %s5143_s24  }
 0x39d   : > { %p14_p6 = scmp.ge.s32.totalorder %s17_s24, 7  }
 0x39f   :  { %16 = sbr.rel (!%p14_p6) target bundleno = 1 (0x1), region = 106 }

</bundles_post_ra>
